<compile_context>
chip_gen: v5e
topology: v5e:2x2
jax: 0.10.0
libtpu: 0.0.40
codegen_flags: <defaults>
</compile_context>

<pallas_src>
import functools
import math

import numpy as np
import jax
import jax.numpy as jnp
from jax import lax
from jax.experimental import pallas as pl
from jax.experimental.pallas import tpu as pltpu


def _butter2_lowpass(fc, fs):
    """2nd-order Butterworth lowpass (bilinear transform); matches scipy.signal.butter(2, 2*fc/fs)."""
    wn = 2.0 * fc / fs                      # normalized cutoff, Nyquist = 1
    k = math.tan(math.pi * wn / 2.0)
    sq2 = math.sqrt(2.0)
    norm = 1.0 / (1.0 + sq2 * k + k * k)
    b0 = k * k * norm
    b1 = 2.0 * b0
    b2 = b0
    a1 = 2.0 * (k * k - 1.0) * norm
    a2 = (1.0 - sq2 * k + k * k) * norm
    return (b0, b1, b2), (1.0, a1, a2)


def _block_iir_constants(b, a, tb):
    """Exact block reformulation of the order-2 IIR over tb samples.

    Returns
      lt : (tb, tb) f32 — transpose of the lower-triangular Toeplitz matrix of
           the impulse response, so  y = u @ lt  is the zero-state block response.
      c  : (8, tb)  f32 — rows 0..3 = zero-input responses to unit initial state
           x[-1], x[-2], y[-1], y[-2]; rows 4..7 are zero padding.
    """
    b0, b1, b2 = b
    _, a1, a2 = a

    def run(u, x1, x2, y1, y2):
        out = np.zeros(tb, dtype=np.float64)
        for n in range(tb):
            xn = u[n]
            yn = b0 * xn + b1 * x1 + b2 * x2 - a1 * y1 - a2 * y2
            out[n] = yn
            x2, x1 = x1, xn
            y2, y1 = y1, yn
        return out

    imp = np.zeros(tb, dtype=np.float64)
    imp[0] = 1.0
    h = run(imp, 0.0, 0.0, 0.0, 0.0)
    idx = np.arange(tb)
    lower = idx[:, None] >= idx[None, :]
    L = np.where(lower, h[(idx[:, None] - idx[None, :]) % tb], 0.0)

    z = np.zeros(tb, dtype=np.float64)
    c = np.zeros((8, tb), dtype=np.float64)
    c[0] = run(z, 1.0, 0.0, 0.0, 0.0)     # response to x[-1] = 1
    c[1] = run(z, 0.0, 1.0, 0.0, 0.0)     # response to x[-2] = 1
    c[2] = run(z, 0.0, 0.0, 1.0, 0.0)     # response to y[-1] = 1
    c[3] = run(z, 0.0, 0.0, 0.0, 1.0)     # response to y[-2] = 1
    return jnp.asarray(L.T, dtype=jnp.float32), jnp.asarray(c, dtype=jnp.float32)


def _hwrlp_kernel(lt_ref, c_ref, x_ref, o_ref, state_ref, *, t_total, tb, mask_time):
    """relu -> exact block IIR lowpass -> relu on one (CN, TB) tile.

    x_ref / o_ref blocks are (CN, TB): channels on sublanes, time on lanes
    (native layout).  state_ref (CN, 4) f32 carries [x1, x2, y1, y2] across
    time blocks (grid axis 1, sequential).
    """
    t_blk = pl.program_id(1)

    @pl.when(t_blk == 0)
    def _():
        state_ref[...] = jnp.zeros_like(state_ref)

    # first halfwave rectification, fused with the load; recursion in f32
    u = jnp.maximum(x_ref[...].astype(jnp.float32), 0.0)
    if mask_time:
        # ragged last time block: zero out-of-range columns so stale VMEM
        # (possibly NaN/Inf) cannot leak into valid outputs through the matmul.
        col = lax.broadcasted_iota(jnp.int32, u.shape, 1)
        u = jnp.where(col + t_blk * tb < t_total, u, 0.0)

    # zero-state response of the block on the MXU (f32 precision)
    y = jnp.dot(u, lt_ref[...], preferred_element_type=jnp.float32,
                precision=lax.Precision.HIGHEST)
    # zero-input response: inject the carried state (4 rank-1 updates on the VPU)
    y = (y
         + state_ref[:, 0:1] * c_ref[0:1, :]
         + state_ref[:, 1:2] * c_ref[1:2, :]
         + state_ref[:, 2:3] * c_ref[2:3, :]
         + state_ref[:, 3:4] * c_ref[3:4, :])

    # carry x[-1], x[-2], y[-1], y[-2] into the next time block
    state_ref[:, 0:1] = u[:, -1:]
    state_ref[:, 1:2] = u[:, -2:-1]
    state_ref[:, 2:3] = y[:, -1:]
    state_ref[:, 3:4] = y[:, -2:-1]

    # second halfwave rectification, fused with the full-tile store
    o_ref[...] = jnp.maximum(y, 0.0).astype(o_ref.dtype)


def halfwave_rectification_lowpass_ihc(x, fc=1000.0, fs=20000.0, order=2,
                                       channel_block=512, time_block=256):
    """Pallas TPU forward pass of HalfwaveRectificationLowpassIHC.

    relu -> 2nd-order Butterworth IIR lowpass along the last (time) axis -> relu.
    """
    # TODO(synk): only the default order=2 Butterworth design is implemented in
    # closed form; other orders would need a cascade of biquad blocks.
    if order != 2:
        raise NotImplementedError("only order=2 Butterworth lowpass is implemented")
    b, a = _butter2_lowpass(fc, fs)

    orig_shape = x.shape
    T = int(orig_shape[-1])
    if T < 2:
        raise NotImplementedError("time axis must have at least 2 samples")
    N = 1
    for d in orig_shape[:-1]:
        N *= int(d)
    x2d = x.reshape(N, T)               # free: collapse leading dims, time stays minor

    # time block (lane axis): multiple of 128, or the full axis when T < 128
    tb = min(time_block, T)
    tb = (tb // 128) * 128 if tb >= 128 else T
    mask_time = (T % tb) != 0

    # channel block (sublane axis): multiple of the sublane packing for the dtype
    itemsize = jnp.dtype(x.dtype).itemsize
    sub = max(8, 32 // max(itemsize, 1))
    if N < sub:
        cn = N                          # full-dim block (allowed for any size)
    else:
        cn = min(channel_block, (N // sub) * sub)
        if -(-N // cn) < 2 and N >= 2 * sub:
            # guarantee >= 2 channel blocks so v7x's second TensorCore gets work
            half = (N + 1) // 2
            cn = min(cn, ((half + sub - 1) // sub) * sub)

    lt, c = _block_iir_constants(b, a, tb)

    kernel = functools.partial(_hwrlp_kernel, t_total=T, tb=tb, mask_time=mask_time)
    grid = (pl.cdiv(N, cn), pl.cdiv(T, tb))

    out = pl.pallas_call(
        kernel,
        out_shape=jax.ShapeDtypeStruct((N, T), x.dtype),
        grid_spec=pltpu.PrefetchScalarGridSpec(
            num_scalar_prefetch=0,
            grid=grid,
            in_specs=[
                pl.BlockSpec((tb, tb), lambda n, t: (0, 0)),   # L^T, stays resident
                pl.BlockSpec((8, tb), lambda n, t: (0, 0)),    # state-injection vectors
                pl.BlockSpec((cn, tb), lambda n, t: (n, t)),   # input tile
            ],
            out_specs=pl.BlockSpec((cn, tb), lambda n, t: (n, t)),
            scratch_shapes=[pltpu.VMEM((cn, 4), jnp.float32)],  # (x1, x2, y1, y2)
        ),
        compiler_params=pltpu.CompilerParams(
            # channel blocks are independent (sharded across TCs);
            # the time axis carries IIR state in scratch -> must stay sequential.
            dimension_semantics=("parallel", "arbitrary"),
            vmem_limit_bytes=32 * 1024 * 1024,
        ),
    )(lt, c, x2d)

    return out.reshape(orig_shape)


if __name__ == "__main__":
    key = jax.random.PRNGKey(0)
    # (batch=2, channels=4, time=640): 8 independent sequences, 3 time blocks
    # at TB=256 (last one ragged) -> exercises state carry + edge masking.
    x = jax.random.normal(key, (2, 4, 640), dtype=jnp.float32)

    fc, fs = 1000.0, 20000.0
    fwd = jax.jit(functools.partial(halfwave_rectification_lowpass_ihc, fc=fc, fs=fs))
    y = fwd(x)
    y = jax.block_until_ready(y)

    # pure-JAX reference: relu -> lfilter (Direct-Form-I scan, f32) -> relu
    (b0, b1, b2), (_, a1, a2) = _butter2_lowpass(fc, fs)
    xr = jnp.maximum(x, 0.0)

    def step(carry, xt):
        x1, x2, y1, y2 = carry
        yt = b0 * xt + b1 * x1 + b2 * x2 - a1 * y1 - a2 * y2
        return (xt, x1, yt, y1), yt

    z = jnp.zeros(x.shape[:-1], jnp.float32)
    _, ys = lax.scan(step, (z, z, z, z), jnp.moveaxis(xr, -1, 0))
    y_ref = jnp.maximum(jnp.moveaxis(ys, 0, -1), 0.0)

    assert y.shape == x.shape
    err = float(jnp.max(jnp.abs(y - y_ref)))
    assert jnp.allclose(y, y_ref, rtol=1e-4, atol=1e-5), err

    print("KERNEL_OK")
</pallas_src>

<mosaic_0001>
module attributes {stable_mosaic.version = 11 : i64} {
  func.func @_hwrlp_kernel(%arg0: i32, %arg1: i32, %arg2: memref<256x256xf32, #tpu.memory_space<vmem>>, %arg3: memref<8x256xf32, #tpu.memory_space<vmem>>, %arg4: memref<8x256xf32, #tpu.memory_space<vmem>>, %arg5: memref<8x256xf32, #tpu.memory_space<vmem>>, %arg6: memref<8x4xf32, #tpu.memory_space<vmem>>) attributes {dimension_semantics = [#tpu.dimension_semantics<parallel>, #tpu.dimension_semantics<arbitrary>], iteration_bounds = array<i64: 1, 3>, scalar_prefetch = 0 : i64, scratch_operands = 1 : i64, tpu.core_type = #tpu.core_type<tc>, window_params = [{pipeline_mode = #tpu.pipeline_mode<synchronous>, transform_indices = @transform_0, window_bounds = array<i64: 256, 256>}, {pipeline_mode = #tpu.pipeline_mode<synchronous>, transform_indices = @transform_1, window_bounds = array<i64: 8, 256>}, {transform_indices = @transform_2, window_bounds = array<i64: 8, 256>}, {transform_indices = @transform_3, window_bounds = array<i64: 8, 256>}]} {
    %c0_i32 = arith.constant 0 : i32
    %0 = arith.cmpi eq, %arg1, %c0_i32 : i32
    %1 = arith.extui %0 : i1 to i32
    %c0_i32_0 = arith.constant 0 : i32
    %2 = arith.cmpi ne, %1, %c0_i32_0 : i32
    scf.if %2 {
      %cst_30 = arith.constant 0.000000e+00 : f32
      %51 = vector.broadcast %cst_30 : f32 to vector<8x4xf32>
      %c0_31 = arith.constant 0 : index
      %c0_32 = arith.constant 0 : index
      %52 = vector.load %arg6[%c0_31, %c0_32] : memref<8x4xf32, #tpu.memory_space<vmem>>, vector<8x4xf32>
      tpu.vector_store %arg6[%c0_31, %c0_32], %51 {strides = array<i32>} : memref<8x4xf32, #tpu.memory_space<vmem>>, vector<8x4xf32>,
    } else {
    }
    %c0 = arith.constant 0 : index
    %c0_1 = arith.constant 0 : index
    %3 = vector.load %arg4[%c0, %c0_1] : memref<8x256xf32, #tpu.memory_space<vmem>>, vector<8x256xf32>
    %cst = arith.constant 0.000000e+00 : f32
    %4 = vector.broadcast %cst : f32 to vector<8x256xf32>
    %5 = arith.maximumf %3, %4 : vector<8x256xf32>
    %6 = tpu.iota {dimensions = array<i32: 1>} : vector<8x256xi32>
    %c256_i32 = arith.constant 256 : i32
    %7 = arith.muli %arg1, %c256_i32 : i32
    %8 = vector.broadcast %7 : i32 to vector<8x256xi32>
    %9 = arith.addi %6, %8 : vector<8x256xi32>
    %c640_i32 = arith.constant 640 : i32
    %10 = vector.broadcast %c640_i32 : i32 to vector<8x256xi32>
    %11 = arith.cmpi slt, %9, %10 : vector<8x256xi32>
    %cst_2 = arith.constant 0.000000e+00 : f32
    %12 = vector.broadcast %cst_2 : f32 to vector<8x256xf32>
    %13 = arith.select %11, %5, %12 : vector<8x256xi1>, vector<8x256xf32>
    %c0_3 = arith.constant 0 : index
    %c0_4 = arith.constant 0 : index
    %14 = vector.load %arg2[%c0_3, %c0_4] : memref<256x256xf32, #tpu.memory_space<vmem>>, vector<256x256xf32>
    %cst_5 = arith.constant dense<0.000000e+00> : vector<8x256xf32>
    %15 = tpu.matmul %13, %14, %cst_5 {dimension_numbers = #tpu.dot_dimension_numbers<[1], [0], [0], [1], [0, 0, 1, 1], [], []>, precision = #tpu.contract_precision<fp32>} : vector<8x256xf32>, vector<256x256xf32>, vector<8x256xf32> -> vector<8x256xf32>
    %c0_6 = arith.constant 0 : index
    %c0_7 = arith.constant 0 : index
    %16 = vector.load %arg6[%c0_6, %c0_7] : memref<8x4xf32, #tpu.memory_space<vmem>>, vector<8x1xf32>
    %c0_8 = arith.constant 0 : index
    %c0_9 = arith.constant 0 : index
    %17 = vector.load %arg3[%c0_8, %c0_9] : memref<8x256xf32, #tpu.memory_space<vmem>>, vector<1x256xf32>
    %18 = vector.broadcast %16 : vector<8x1xf32> to vector<8x256xf32>
    %19 = vector.broadcast %17 : vector<1x256xf32> to vector<8x256xf32>
    %20 = arith.mulf %18, %19 : vector<8x256xf32>
    %21 = arith.addf %15, %20 : vector<8x256xf32>
    %c0_10 = arith.constant 0 : index
    %c1 = arith.constant 1 : index
    %22 = vector.load %arg6[%c0_10, %c1] : memref<8x4xf32, #tpu.memory_space<vmem>>, vector<8x1xf32>
    %c1_11 = arith.constant 1 : index
    %c0_12 = arith.constant 0 : index
    %23 = vector.load %arg3[%c1_11, %c0_12] : memref<8x256xf32, #tpu.memory_space<vmem>>, vector<1x256xf32>
    %24 = vector.broadcast %22 : vector<8x1xf32> to vector<8x256xf32>
    %25 = vector.broadcast %23 : vector<1x256xf32> to vector<8x256xf32>
    %26 = arith.mulf %24, %25 : vector<8x256xf32>
    %27 = arith.addf %21, %26 : vector<8x256xf32>
    %c0_13 = arith.constant 0 : index
    %c2 = arith.constant 2 : index
    %28 = vector.load %arg6[%c0_13, %c2] : memref<8x4xf32, #tpu.memory_space<vmem>>, vector<8x1xf32>
    %c2_14 = arith.constant 2 : index
    %c0_15 = arith.constant 0 : index
    %29 = vector.load %arg3[%c2_14, %c0_15] : memref<8x256xf32, #tpu.memory_space<vmem>>, vector<1x256xf32>
    %30 = vector.broadcast %28 : vector<8x1xf32> to vector<8x256xf32>
    %31 = vector.broadcast %29 : vector<1x256xf32> to vector<8x256xf32>
    %32 = arith.mulf %30, %31 : vector<8x256xf32>
    %33 = arith.addf %27, %32 : vector<8x256xf32>
    %c0_16 = arith.constant 0 : index
    %c3 = arith.constant 3 : index
    %34 = vector.load %arg6[%c0_16, %c3] : memref<8x4xf32, #tpu.memory_space<vmem>>, vector<8x1xf32>
    %c3_17 = arith.constant 3 : index
    %c0_18 = arith.constant 0 : index
    %35 = vector.load %arg3[%c3_17, %c0_18] : memref<8x256xf32, #tpu.memory_space<vmem>>, vector<1x256xf32>
    %36 = vector.broadcast %34 : vector<8x1xf32> to vector<8x256xf32>
    %37 = vector.broadcast %35 : vector<1x256xf32> to vector<8x256xf32>
    %38 = arith.mulf %36, %37 : vector<8x256xf32>
    %39 = arith.addf %33, %38 : vector<8x256xf32>
    %40 = vector.extract_strided_slice %13 {offsets = [0, 255], sizes = [8, 1], strides = [1, 1]} : vector<8x256xf32> to vector<8x1xf32>
    %c0_19 = arith.constant 0 : index
    %c0_20 = arith.constant 0 : index
    %41 = vector.load %arg6[%c0_19, %c0_20] : memref<8x4xf32, #tpu.memory_space<vmem>>, vector<8x1xf32>
    tpu.vector_store %arg6[%c0_19, %c0_20], %40 {strides = array<i32>} : memref<8x4xf32, #tpu.memory_space<vmem>>, vector<8x1xf32>,
    %42 = vector.extract_strided_slice %13 {offsets = [0, 254], sizes = [8, 1], strides = [1, 1]} : vector<8x256xf32> to vector<8x1xf32>
    %c0_21 = arith.constant 0 : index
    %c1_22 = arith.constant 1 : index
    %43 = vector.load %arg6[%c0_21, %c1_22] : memref<8x4xf32, #tpu.memory_space<vmem>>, vector<8x1xf32>
    tpu.vector_store %arg6[%c0_21, %c1_22], %42 {strides = array<i32>} : memref<8x4xf32, #tpu.memory_space<vmem>>, vector<8x1xf32>,
    %44 = vector.extract_strided_slice %39 {offsets = [0, 255], sizes = [8, 1], strides = [1, 1]} : vector<8x256xf32> to vector<8x1xf32>
    %c0_23 = arith.constant 0 : index
    %c2_24 = arith.constant 2 : index
    %45 = vector.load %arg6[%c0_23, %c2_24] : memref<8x4xf32, #tpu.memory_space<vmem>>, vector<8x1xf32>
    tpu.vector_store %arg6[%c0_23, %c2_24], %44 {strides = array<i32>} : memref<8x4xf32, #tpu.memory_space<vmem>>, vector<8x1xf32>,
    %46 = vector.extract_strided_slice %39 {offsets = [0, 254], sizes = [8, 1], strides = [1, 1]} : vector<8x256xf32> to vector<8x1xf32>
    %c0_25 = arith.constant 0 : index
    %c3_26 = arith.constant 3 : index
    %47 = vector.load %arg6[%c0_25, %c3_26] : memref<8x4xf32, #tpu.memory_space<vmem>>, vector<8x1xf32>
    tpu.vector_store %arg6[%c0_25, %c3_26], %46 {strides = array<i32>} : memref<8x4xf32, #tpu.memory_space<vmem>>, vector<8x1xf32>,
    %cst_27 = arith.constant 0.000000e+00 : f32
    %48 = vector.broadcast %cst_27 : f32 to vector<8x256xf32>
    %49 = arith.maximumf %39, %48 : vector<8x256xf32>
    %c0_28 = arith.constant 0 : index
    %c0_29 = arith.constant 0 : index
    %50 = vector.load %arg5[%c0_28, %c0_29] : memref<8x256xf32, #tpu.memory_space<vmem>>, vector<8x256xf32>
    tpu.vector_store %arg5[%c0_28, %c0_29], %49 {strides = array<i32>} : memref<8x256xf32, #tpu.memory_space<vmem>>, vector<8x256xf32>,
    return
  }
  func.func @transform_0(%arg0: i32, %arg1: i32) -> (i32, i32) {
    %c0_i32 = arith.constant 0 : i32
    %c0_i32_0 = arith.constant 0 : i32
    %c0_i32_1 = arith.constant 0 : i32
    return %c0_i32, %c0_i32_0 : i32, i32
  }
  func.func @transform_1(%arg0: i32, %arg1: i32) -> (i32, i32) {
    %c0_i32 = arith.constant 0 : i32
    %c0_i32_0 = arith.constant 0 : i32
    %c0_i32_1 = arith.constant 0 : i32
    return %c0_i32, %c0_i32_0 : i32, i32
  }
  func.func @transform_2(%arg0: i32, %arg1: i32) -> (i32, i32) {
    %c0_i32 = arith.constant 0 : i32
    return %arg0, %arg1 : i32, i32
  }
  func.func @transform_3(%arg0: i32, %arg1: i32) -> (i32, i32) {
    %c0_i32 = arith.constant 0 : i32
    return %arg0, %arg1 : i32, i32
  }
}

</mosaic_0001>

<bundles_post_ra>
// kernel: halfwave_rectification_lowpass_ihc.1
= control target key start
LH: loop header
LB: loop body
LE: loop exit
PB: predicated region body
PF: predicated region fallthrough
CT: control target
= control target key end

     0   :  { %8 = vsyncpa [#allocation4], 0  ;;  %s2699_s12 = smov 0   ;;  %s2701_s13 = smov 0   ;;  %s4117_s0 = inlined_call_operand.hbm [shape: f32[256,256], index: 0, kind: input, shape index: {}]   ;;  %s4118_s1 = inlined_call_operand.vmem [shape: f32[8,256], index: 1, kind: input, shape index: {}]   ;;  %s4119_s2 = inlined_call_operand.vmem [shape: f32[8,640], index: 2, kind: input, shape index: {}]   ;;  %s4120_s3 = inlined_call_operand.vmem [shape: f32[8,640], index: 3, kind: output, shape index: {}]  }
   0x1   :  { %s2703_s14 = smov 0   ;;  %s2705_s15 = smov 0  }
   0x2   :  { %s2707_s16 = smov 0  }
   0x3 LB: > { %s2217_s17 = sadd.s32 4294967295, %s2600_s16   ;;  %s23_s18 = sadd.s32 1, %s2596_s15  ;;  %s2600_s16 = sphi %s2707_s16, %s14_s16   ;;  %s2596_s15 = sphi %s2705_s15, %s4281_s15   ;;  %s2592_s14 = sphi %s2703_s14, %s4280_s14   ;;  %s2588_s13 = sphi %s2701_s13, %s4279_s13   ;;  %s2584_s12 = sphi %s2699_s12, %s4278_s12  }
   0x4   : > { %p24_p0 = scmp.ge.s32.totalorder %s23_s18, 3  ;;  %s105_s19 = sadd.s32 1, %s2588_s13 }
   0x5   : > { %p115_p1 = scmp.ne.s32.totalorder %s2588_s13, %s2584_s12  ;;  %p116_p2 = scmp.eq.s32.totalorder %s2217_s17, 2 }
   0x6   : > { %s4283_s18 = smov (%p24_p0, %s23_s18), 0  ;;  %p2219_p4 = scmp.ge.s32.totalorder %s2600_s16, 1 }
   0x7   : > { %p2731_p3 = por %p116_p2, %p115_p1  ;;  %s101_s21 = ssub.s32 %s2596_s15, %s4283_s18 }
   0x8   : > { %p129_p5 = scmp.lt.s32.totalorder %s2600_s16, 4  ;;  %p103_p6 = scmp.eq.s32.totalorder %s101_s21, 0 }
   0x9   : > { %p2739_p8 = scmp.eq.s32.totalorder %s2217_s17, 0  ;;  %s140_s26 = sshll.u32 %s4117_s0, 4  ;;  %s141_s26 = int_to_ptr.hbm [resolvable:$true] %s140_s26 }
   0xa   : > { %p130_p7 = pnand %p2219_p4, %p129_p5  ;;  %s2666_s27 = smov [#allocation3]  }
   0xb   : > { %s2744_s23 = scalar_select %p103_p6, %s2588_s13, %s105_s19  }
   0xc   : > { %p2272_p9 = pneg %p130_p7  ;;  %s142_s28 = sshll.u32 %s2666_s27, 4  ;;  %s143_s28 = int_to_ptr.vmem [resolvable:$true] %s142_s28 }
   0xd   : > { %s2667_s29 = smov 256   ;;  %s2668_s30 = smov 16  }
   0xe   : > { %p2273_p10 = pnand %p2739_p8, %p2272_p9  ;;  %182 = sbr.rel (%p130_p7) target bundleno = 649 (0x289), region = 32 }
  0x10   : > { %2275 = dma.hbm_to_vmem [thread:$0]  (!%p2273_p10), %s141_s26, 8192, %s143_s28, [#allocation4], %s2667_s29, %s2667_s29, %s2668_s30  }
  0x13   : > { %2579 = dma.done.wait (%p2739_p8), [#allocation4], 8192  }
  0x14   : > { %2581 = vsyncadd (%p2739_p8), [#allocation4], 4294959104  ;;  %s211_s4 = sand.u32 1, %s2584_s12   ;;  %s2757_s5 = sshll.u32 %s2592_s14, 1 }
  0x15   : > { %s2224_s6 = sshll.u32 %s211_s4, 4  ;;  %p221_p11 = scmp.lt.s32.totalorder %s2757_s5, 4 }
  0x16   : > { %s2766_s17 = scalar_lea.vmem [#allocation5], %s2224_s6   ;;  %p2227_p12 = scmp.ne.s32.totalorder %s2592_s14, 0 }
  0x17   : > { %s222_s7 = scalar_select %p221_p11, %s2757_s5, 4 }
  0x18   : > { %240 = sbr.rel (%p2227_p12) target bundleno = 31 (0x1f), region = 40 }
  0x19   : > { %s2226_s8 = sshll.u32 %s222_s7, 3 }
  0x1a   : > { %s2764_s11 = scalar_lea.vmem %s4119_s2, %s2226_s8 }
  0x1d   : > { %vm241_vm0 = vcmask 31744   ;;  %v2669_v0 = vmov 0.0  }
  0x1e   : > { %242 = vst.msk [vmem:[#allocation2] sm:$0xff] %vm241_vm0, %v2669_v0 }
  0x1f PF: > { %v288_v1 = vld [vmem:[#allocation3 + $0xf0] sm:$0xff]  ;;  %v286_v2 = vld [vmem:[#allocation3 + $0xe0] sm:$0xff]  ;;  %s2228_s12 = sshll.u32 %s2592_s14, 8  ;;  %s2674_s22 = smov 1   ;;  %vm1749_vm3 = vcmask 7168   ;;  %vm1754_vm4 = vcmask 15368  }
  0x20   : > { %v284_v3 = vld [vmem:[#allocation3 + $0xd0] sm:$0xff]  ;;  %v2769_v4 = vand.u32 4294901760, %v288_v1  ;;  %v2771_v5 = vand.u32 4294901760, %v286_v2  ;;  %v282_v7 = vld [vmem:[#allocation3 + $0xc0] sm:$0xff]  ;;  %s2675_s24 = smov 3   ;;  %s2676_s4 = smov 5  }
  0x21   : > { %v2773_v6 = vand.u32 4294901760, %v284_v3  ;;  %v280_v8 = vld [vmem:[#allocation3 + $0xb0] sm:$0xff]  ;;  %v278_v9 = vld [vmem:[#allocation3 + $0xa0] sm:$0xff]  ;;  %v2775_v10 = vand.u32 4294901760, %v282_v7  ;;  %vm1760_vm5 = vcmask 23568   ;;  %vm1765_vm6 = vcmask 31768  }
  0x22   : > { %v2777_v11 = vand.u32 4294901760, %v280_v8  ;;  %v2779_v12 = vand.u32 4294901760, %v278_v9  ;;  %v276_v13 = vld [vmem:[#allocation3 + $0x90] sm:$0xff]  ;;  %v274_v14 = vld [vmem:[#allocation3 + $0x80] sm:$0xff]  ;;  %337 = vmatpush.msra.mxu0 %v2769_v4  ;;  %v2783_v15 = vsub.f32 %v288_v1, %v2769_v4  ;;  %v2786_v16 = vsub.f32 %v286_v2, %v2771_v5  ;;  %533 = vmatpush.msra.mxu3 %v2769_v4  ;;  %s1779_s6 = ssub.s32 (%p2731_p3), 5, %s2757_s5  ;;  %s2263_s7 = sshll.u32 (%p2731_p3), %s2592_s14, 4 }
  0x23   : > { %v2790_v17 = vsub.f32 %v284_v3, %v2773_v6  ;;  %v2792_v18 = vand.u32 4294901760, %v276_v13  ;;  %v272_v19 = vld [vmem:[#allocation3 + $0x70] sm:$0xff]  ;;  %v2795_v20 = vsub.f32 %v282_v7, %v2775_v10  ;;  %v2808_v26 = vand.u32 4294901760, %v274_v14  ;;  %v270_v27 = vld [vmem:[#allocation3 + $0x60] sm:$0xff]  ;;  %p1780_p13 = scmp.lt.s32.totalorder (%p2731_p3), %s1779_s6, 2  ;;  %s3824_s10 = scalar_lea.vmem (%p2731_p3), %s4120_s3, %s2263_s7  }
  0x24   : > { %v2798_v21 = vsub.f32 %v280_v8, %v2777_v11  ;;  %v2801_v22 = vsub.f32 %v278_v9, %v2779_v12  ;;  %339 = vmatpush.msra.mxu0 %v2771_v5  ;;  %480 = vmatpush.msra.mxu2 %v2783_v15  ;;  %v379_v23 = vand.u32 4294901760, %v2783_v15  ;;  %v4135_v24 = vand.u32 4294901760, %v2786_v16  ;;  %v268_v37 = vld [vmem:[#allocation3 + $0x50] sm:$0xff]  ;;  %v266_v43 = vld [vmem:[#allocation3 + $0x40] sm:$0xff] }
  0x25   : > { %v4134_v25 = vand.u32 4294901760, %v2790_v17  ;;  %535 = vmatpush.msra.mxu3 %v2771_v5  ;;  %v4131_v28 = vand.u32 4294901760, %v2795_v20  ;;  %v2812_v29 = vand.u32 4294901760, %v272_v19  ;;  %v2815_v30 = vsub.f32 %v276_v13, %v2792_v18  ;;  %v264_v49 = vld [vmem:[#allocation3 + $0x30] sm:$0xff]  ;;  %v262_v55 = vld [vmem:[#allocation3 + $0x20] sm:$0xff] }
  0x26   : > { %341 = vmatpush.msra.mxu0 %v2773_v6  ;;  %483 = vmatpush.msra.mxu2 %v2786_v16  ;;  %v380_v31 = vsub.f32 %v2783_v15, %v379_v23  ;;  %v386_v32 = vsub.f32 %v2786_v16, %v4135_v24  ;;  %v4130_v34 = vand.u32 4294901760, %v2798_v21  ;;  %v2830_v35 = vand.u32 4294901760, %v270_v27  ;;  %v320_v60 = vld [vmem:[#allocation3 + $0x1f0] sm:$0xff]  ;;  %v258_v3 = vld [vmem:[#allocation3] sm:$0xff] }
  0x27   : > { %v392_v33 = vsub.f32 %v2790_v17, %v4134_v25  ;;  %537 = vmatpush.msra.mxu3 %v2773_v6  ;;  %v4128_v36 = vand.u32 4294901760, %v2801_v22  ;;  %v398_v40 = vsub.f32 %v2795_v20, %v4131_v28  ;;  %v2839_v41 = vsub.f32 %v274_v14, %v2808_v26  ;;  %v260_v62 = vld [vmem:[#allocation3 + $0x10] sm:$0xff]  ;;  %v318_v7 = vld [vmem:[#allocation3 + $0x1e0] sm:$0xff] }
  0x28   : > { %343 = vmatpush.msra.mxu0 %v2775_v10  ;;  %v381_v38 = vand.u32 4294901760, %v380_v31  ;;  %486 = vmatpush.msra.mxu2 %v2790_v17  ;;  %v387_v39 = vand.u32 4294901760, %v386_v32  ;;  %v2843_v42 = vsub.f32 %v272_v19, %v2812_v29  ;;  %v404_v45 = vsub.f32 %v2798_v21, %v4130_v34  ;;  %v304_v28 = vld [vmem:[#allocation3 + $0x170] sm:$0xff]  ;;  %v302_v24 = vld [vmem:[#allocation3 + $0x160] sm:$0xff] }
  0x29   : > { %539 = vmatpush.msra.mxu3 %v2775_v10  ;;  %v393_v44 = vand.u32 4294901760, %v392_v33  ;;  %v2849_v46 = vand.u32 4294901760, %v268_v37  ;;  %v4127_v47 = vand.u32 4294901760, %v2815_v30  ;;  %v410_v48 = vsub.f32 %v2801_v22, %v4128_v36  ;;  %v316_v33 = vld [vmem:[#allocation3 + $0x1d0] sm:$0xff] }
  0x2a   : > { %345 = vmatpush.msra.mxu0 %v2777_v11  ;;  %382 = vmatpush.msra.mxu1 %v381_v38  ;;  %v399_v50 = vand.u32 4294901760, %v398_v40  ;;  %v2858_v51 = vand.u32 4294901760, %v266_v43  ;;  %v4125_v52 = vand.u32 4294901760, %v2839_v41  ;;  %v2862_v53 = vsub.f32 %v270_v27, %v2830_v35 }
  0x2b   : > { %489 = vmatpush.msra.mxu2 %v2795_v20  ;;  %541 = vmatpush.msra.mxu3 %v2777_v11  ;;  %v4124_v54 = vand.u32 4294901760, %v2843_v42  ;;  %v405_v56 = vand.u32 4294901760, %v404_v45  ;;  %v416_v57 = vsub.f32 %v2815_v30, %v4127_v47  ;;  %v2871_v58 = vand.u32 4294901760, %v264_v49  ;;  %v314_v45 = vld [vmem:[#allocation3 + $0x1c0] sm:$0xff] }
  0x2c   : > { %347 = vmatpush.msra.mxu0 %v2779_v12  ;;  %388 = vmatpush.msra.mxu1 %v387_v39  ;;  %v2874_v59 = vsub.f32 %v268_v37, %v2849_v46  ;;  %v411_v61 = vand.u32 4294901760, %v410_v48  ;;  %v422_v63 = vsub.f32 %v2839_v41, %v4125_v52  ;;  %v2882_v0 = vand.u32 4294901760, %v262_v55  ;;  %v308_v52 = vld [vmem:[#allocation3 + $0x190] sm:$0xff]  ;;  %v306_v47 = vld [vmem:[#allocation3 + $0x180] sm:$0xff] }
  0x2d   : > { %492 = vmatpush.msra.mxu2 %v2798_v21  ;;  %543 = vmatpush.msra.mxu3 %v2779_v12  ;;  %v4123_v1 = vand.u32 4294901760, %v2862_v53  ;;  %v2886_v2 = vsub.f32 %v266_v43, %v2858_v51  ;;  %v428_v8 = vsub.f32 %v2843_v42, %v4124_v54  ;;  %v2893_v9 = vand.u32 4294901760, %v320_v60 }
  0x2e   : > { %349 = vmatpush.msra.mxu0 %v2792_v18  ;;  %394 = vmatpush.msra.mxu1 %v393_v44  ;;  %v417_v13 = vand.u32 4294901760, %v416_v57  ;;  %v2896_v14 = vand.u32 4294901760, %v260_v62  ;;  %v4122_v19 = vand.u32 4294901760, %v2874_v59  ;;  %v2900_v27 = vsub.f32 %v264_v49, %v2871_v58 }
  0x2f   : > { %495 = vmatpush.msra.mxu2 %v2801_v22  ;;  %545 = vmatpush.msra.mxu3 %v2792_v18  ;;  %4182 = vst [vmem:[#allocation7_spill] sm:$0xff] %v2893_v9  ;;  %v2904_v31 = vand.u32 4294901760, %v258_v3  ;;  %v2906_v32 = vand.u32 4294901760, %v318_v7  ;;  %v423_v37 = vand.u32 4294901760, %v422_v63  ;;  %v434_v38 = vsub.f32 %v2862_v53, %v4123_v1 }
  0x30   : > { %351 = vmatpush.msra.mxu0 %v2808_v26  ;;  %400 = vmatpush.msra.mxu1 %v399_v50  ;;  %4183 = vst [vmem:[#allocation8_spill] sm:$0xff] %v2896_v14  ;;  %v4121_v39 = vand.u32 4294901760, %v2886_v2  ;;  %v2914_v40 = vsub.f32 %v262_v55, %v2882_v0  ;;  %v429_v43 = vand.u32 4294901760, %v428_v8  ;;  %v2919_v44 = vsub.f32 %v320_v60, %v2893_v9 }
  0x31   : > { %498 = vmatpush.msra.mxu2 %v2815_v30  ;;  %547 = vmatpush.msra.mxu3 %v2808_v26  ;;  %4184 = vst [vmem:[#allocation9_spill] sm:$0xff] %v2904_v31  ;;  %v440_v48 = vsub.f32 %v2874_v59, %v4122_v19  ;;  %v4126_v49 = vand.u32 4294901760, %v2900_v27  ;;  %v2927_v50 = vsub.f32 %v260_v62, %v2896_v14  ;;  %v2929_v55 = vand.u32 4294901760, %v316_v33 }
  0x32   : > { %353 = vmatpush.msra.mxu0 %v2812_v29  ;;  %406 = vmatpush.msra.mxu1 %v405_v56  ;;  %v312_v56 = vld [vmem:[#allocation3 + $0x1b0] sm:$0xff]  ;;  %v2934_v57 = vsub.f32 %v258_v3, %v2904_v31  ;;  %v2937_v60 = vsub.f32 %v318_v7, %v2906_v32  ;;  %v446_v62 = vsub.f32 %v2886_v2, %v4121_v39  ;;  %v4129_v63 = vand.u32 4294901760, %v2914_v40 }
  0x33   : > { %501 = vmatpush.msra.mxu2 %v2839_v41  ;;  %549 = vmatpush.msra.mxu3 %v2812_v29  ;;  %v2944_v8 = vand.u32 4294901760, %v314_v45  ;;  %v4132_v3 = vand.u32 4294901760, %v2919_v44  ;;  %v2949_v7 = vand.u32 4294901760, %v312_v56  ;;  %v4133_v39 = vand.u32 4294901760, %v2927_v50 }
  0x34   : > { %355 = vmatpush.msra.mxu0 %v2830_v35  ;;  %412 = vmatpush.msra.mxu1 %v411_v61  ;;  %v435_v61 = vand.u32 4294901760, %v434_v38  ;;  %v452_v38 = vsub.f32 %v2900_v27, %v4126_v49  ;;  %v2957_v19 = vsub.f32 %v316_v33, %v2929_v55  ;;  %v4137_v1 = vand.u32 4294901760, %v2934_v57 }
  0x35   : > { %504 = vmatpush.msra.mxu2 %v2843_v42  ;;  %551 = vmatpush.msra.mxu3 %v2830_v35  ;;  %v4136_v54 = vand.u32 4294901760, %v2937_v60  ;;  %v2968_v33 = vsub.f32 %v314_v45, %v2944_v8  ;;  %v721_v36 = vsub.f32 %v2919_v44, %v4132_v3  ;;  %v464_v45 = vsub.f32 %v2927_v50, %v4133_v39  ;;  %v243_v39 = vld [vmem:[%s2764_s11] sm:$0xff] }
  0x36   : > { %357 = vmatpush.msra.mxu0 %v2849_v46  ;;  %418 = vmatpush.msra.mxu1 %v417_v13  ;;  %v310_v13 = vld [vmem:[#allocation3 + $0x1a0] sm:$0xff]  ;;  %4185 = vst [vmem:[#allocation10_spill] sm:$0xff] %v2957_v19  ;;  %v2985_v34 = vand.u32 4294901760, %v308_v52  ;;  %v470_v3 = vsub.f32 %v2934_v57, %v4137_v1 }
  0x37   : > { %507 = vmatpush.msra.mxu2 %v2862_v53  ;;  %553 = vmatpush.msra.mxu3 %v2849_v46  ;;  %4186 = vst [vmem:[#allocation11_spill] sm:$0xff] %v2968_v33  ;;  %v2970_v49 = vand.u32 4294901760, %v310_v13  ;;  %v465_v1 = vand.u32 4294901760, %v464_v45  ;;  %v300_v45 = vld [vmem:[#allocation3 + $0x150] sm:$0xff] }
  0x38   : > { %359 = vmatpush.msra.mxu0 %v2858_v51  ;;  %424 = vmatpush.msra.mxu1 %v423_v37  ;;  %v441_v37 = vand.u32 4294901760, %v440_v48  ;;  %v458_v48 = vsub.f32 %v2914_v40, %v4129_v63  ;;  %v4139_v63 = vand.u32 4294901760, %v2957_v19  ;;  %v3014_v15 = vsub.f32 %v308_v52, %v2985_v34 }
  0x39   : > { %510 = vmatpush.msra.mxu2 %v2874_v59  ;;  %555 = vmatpush.msra.mxu3 %v2858_v51  ;;  %v3000_v25 = vsub.f32 %v310_v13, %v2970_v49  ;;  %v4188_v52 = vand.u32 4294901760, %v2968_v33 }
  0x3a   : > { %361 = vmatpush.msra.mxu0 %v2871_v58  ;;  %430 = vmatpush.msra.mxu1 %v429_v43  ;;  %v447_v43 = vand.u32 4294901760, %v446_v62  ;;  %v453_v62 = vand.u32 4294901760, %v452_v38  ;;  %v459_v38 = vand.u32 4294901760, %v458_v48  ;;  %v3006_v48 = vand.u32 4294901760, %v304_v28 }
  0x3b   : > { %513 = vmatpush.msra.mxu2 %v2886_v2  ;;  %557 = vmatpush.msra.mxu3 %v2871_v58  ;;  %v733_v13 = vsub.f32 %v2957_v19, %v4139_v63  ;;  %v471_v63 = vand.u32 4294901760, %v470_v3  ;;  %v298_v3 = vld [vmem:[#allocation3 + $0x140] sm:$0xff] }
  0x3c   : > { %363 = vmatpush.msra.mxu0 %v2882_v0  ;;  %436 = vmatpush.msra.mxu1 %v435_v61  ;;  %v2978_v61 = vsub.f32 %v312_v56, %v2949_v7  ;;  %v727_v56 = vsub.f32 %v2937_v60, %v4136_v54  ;;  %v722_v54 = vand.u32 4294901760, %v721_v36 }
  0x3d   : > { %516 = vmatpush.msra.mxu2 %v2900_v27  ;;  %559 = vmatpush.msra.mxu3 %v2882_v0 }
  0x3e   : > { %365 = vmatpush.msra.mxu0 %v2896_v14  ;;  %442 = vmatpush.msra.mxu1 %v441_v37  ;;  %v2992_v37 = vand.u32 4294901760, %v306_v47  ;;  %v728_v36 = vand.u32 4294901760, %v727_v56  ;;  %v4190_v56 = vand.u32 4294901760, %v2978_v61 }
  0x3f   : > { %519 = vmatpush.msra.mxu2 %v2914_v40  ;;  %561 = vmatpush.msra.mxu3 %v2896_v14  ;;  %v3030_v14 = vstv %s2228_s12 }
  0x40   : > { %367 = vmatpush.msra.mxu0 %v2904_v31  ;;  %448 = vmatpush.msra.mxu1 %v447_v43  ;;  %v3020_v43 = vsub.f32 %v306_v47, %v2992_v37  ;;  %v4189_v47 = vand.u32 4294901760, %v2790_v17  ;;  %v745_v19 = vsub.f32 %v2978_v61, %v4190_v56  ;;  %v245_v17 = vmax.f32 %v243_v39, 0.0  ;;  %v296_v56 = vld [vmem:[#allocation3 + $0x130] sm:$0xff] }
  0x41   : > { %522 = vmatpush.msra.mxu2 %v2927_v50  ;;  %563 = vmatpush.msra.mxu3 %v2904_v31  ;;  %v247_v31 = vlaneseq }
  0x42   : > { %574 = vmatpush.msrb.mxu0 %v379_v23  ;;  %454 = vmatpush.msra.mxu1 %v453_v62  ;;  %v4187_v23 = vand.u32 4294901760, %v2786_v16  ;;  %v3022_v62 = vand.u32 4294901760, %v302_v24  ;;  %v739_v16 = vsub.f32 %v2968_v33, %v4188_v52  ;;  %v734_v52 = vand.u32 4294901760, %v733_v13 }
  0x43   : > { %525 = vmatpush.msra.mxu2 %v2934_v57  ;;  %723 = vmatpush.msrb.mxu3 %v722_v54  ;;  %v3042_v33 = vand.u32 4294901760, %v300_v45  ;;  %v4191_v54 = vand.u32 4294901760, %v2795_v20  ;;  %v4192_v13 = vand.u32 4294901760, %v3000_v25  ;;  %v4193_v20 = vand.u32 4294901760, %v2798_v21 }
  0x44   : > { %578 = vmatpush.msrb.mxu0 %v4187_v23  ;;  %460 = vmatpush.msra.mxu1 %v459_v38  ;;  %v3038_v38 = vsub.f32 %v304_v28, %v3006_v48  ;;  %v3048_v28 = vsub.f32 %v302_v24, %v3022_v62  ;;  %v3055_v23 = vand.u32 4294901760, %v298_v3  ;;  %v746_v24 = vand.u32 4294901760, %v745_v19 }
  0x45   : > { %678 = vmatpush.msrb.mxu2 %v2893_v9  ;;  %v248_v9 = vand.u32 127, %v247_v31  ;;  %729 = vmatpush.msrb.mxu3 %v728_v36  ;;  %v740_v31 = vand.u32 4294901760, %v739_v16  ;;  %v751_v39 = vsub.f32 %v3000_v25, %v4192_v13  ;;  %v3068_v13 = vand.u32 4294901760, %v296_v56 }
  0x46   : > { %582 = vmatpush.msrb.mxu0 %v4189_v47  ;;  %466 = vmatpush.msra.mxu1 %v465_v1  ;;  %v4148_v47 = vand.u32 4294901760, %v3020_v43  ;;  %v4147_v36 = vand.u32 4294901760, %v3038_v38  ;;  %v774_v19 = vand.u32 4294901760, %v3048_v28 }
  0x47   : > { %680 = vmatpush.msrb.mxu2 %v2906_v32  ;;  %v252_v1 = vadd.s32 %v3030_v14, %v248_v9  ;;  %735 = vmatpush.msrb.mxu3 %v734_v52  ;;  %v294_v52 = vld [vmem:[#allocation3 + $0x120] sm:$0xff] }
  0x48   : > { %586 = vmatpush.msrb.mxu0 %v4191_v54  ;;  %472 = vmatpush.msra.mxu1 %v471_v63  ;;  %v4194_v63 = vand.u32 4294901760, %v3014_v15  ;;  %v3066_v54 = vsub.f32 %v300_v45, %v3042_v33  ;;  %v752_v45 = vand.u32 4294901760, %v751_v39  ;;  %v3094_v39 = vsub.f32 %v296_v56, %v3068_v13 }
  0x49   : > { %682 = vmatpush.msrb.mxu2 %v2929_v55  ;;  %vm254_vm1 = vcmp.lt.s32.totalorder %v252_v1, 640  ;;  %741 = vmatpush.msrb.mxu3 %v740_v31  ;;  %v3079_v1 = vsub.f32 %v298_v3, %v3055_v23 }
  0x4a   : > { %590 = vmatpush.msrb.mxu0 %v4193_v20  ;;  %641 = vmatpush.msrb.mxu1 %v2769_v4  ;;  %v757_v16 = vsub.f32 %v3014_v15, %v4194_v63  ;;  %v256_v21 = vsel %vm254_vm1, %v245_v17, 0.0  ;;  %v4195_v20 = vand.u32 4294901760, %v2801_v22  ;;  %v763_v4 = vsub.f32 %v3020_v43, %v4148_v47 }
  0x4b   : > { %684 = vmatpush.msrb.mxu2 %v2944_v8  ;;  %v249_v17 = vadd.s32 128, %v248_v9  ;;  %v3081_v63 = vand.u32 4294901760, %v256_v21  ;;  %v4197_v22 = vand.u32 4294901760, %v2815_v30  ;;  %747 = vmatpush.msrb.mxu3 %v746_v24  ;;  %v780_v3 = vand.u32 4294901760, %v3066_v54 }
  0x4c   : > { %594 = vmatpush.msrb.mxu0 %v4195_v20  ;;  %643 = vmatpush.msrb.mxu1 %v2771_v5  ;;  %v769_v5 = vsub.f32 %v3038_v38, %v4147_v36  ;;  %v292_v20 = vld [vmem:[#allocation3 + $0x110] sm:$0xff]  ;;  %v758_v31 = vand.u32 4294901760, %v757_v16  ;;  %v3091_v9 = vand.u32 4294901760, %v294_v52  ;;  %v4198_v30 = vand.u32 4294901760, %v2839_v41  ;;  %v290_v36 = vld [vmem:[#allocation3 + $0x100] sm:$0xff] }
  0x4d   : > { %686 = vmatpush.msrb.mxu2 %v2949_v7  ;;  %4196 = vst [vmem:[#allocation12_spill] sm:$0xff] %v3081_v63  ;;  %753 = vmatpush.msrb.mxu3 %v752_v45  ;;  %v786_v24 = vand.u32 4294901760, %v3079_v1  ;;  %v244_v16 = vld [vmem:[%s2764_s11 + $0x8] sm:$0xff]  ;;  %v253_v56 = vadd.s32 %v3030_v14, %v249_v17  ;;  %v3107_v47 = vsub.f32 %v256_v21, %v3081_v63  ;;  %v3109_v41 = vand.u32 4294901760, %v292_v20 }
  0x4e   : > { %598 = vmatpush.msrb.mxu0 %v4197_v22  ;;  %645 = vmatpush.msrb.mxu1 %v2773_v6  ;;  %v764_v6 = vand.u32 4294901760, %v763_v4  ;;  %v775_v22 = vsub.f32 %v3048_v28, %v774_v19  ;;  %v770_v4 = vand.u32 4294901760, %v769_v5  ;;  %v781_v45 = vsub.f32 %v3066_v54, %v780_v3 }
  0x4f   : > { %688 = vmatpush.msrb.mxu2 %v2970_v49  ;;  %759 = vmatpush.msrb.mxu3 %v758_v31  ;;  %v792_v14 = vand.u32 4294901760, %v3094_v39  ;;  %v3120_v21 = vsub.f32 %v294_v52, %v3091_v9  ;;  %v3122_v17 = vand.u32 4294901760, %v290_v36  ;;  %v246_v5 = vmax.f32 %v244_v16, 0.0 }
  0x50   : > { %602 = vmatpush.msrb.mxu0 %v4198_v30  ;;  %647 = vmatpush.msrb.mxu1 %v2775_v10  ;;  %v4199_v10 = vand.u32 4294901760, %v2843_v42  ;;  %v4200_v42 = vand.u32 4294901760, %v2862_v53  ;;  %v787_v31 = vsub.f32 %v3079_v1, %v786_v24  ;;  %vm255_vm2 = vcmp.lt.s32.totalorder %v253_v56, 640 }
  0x51   : > { %690 = vmatpush.msrb.mxu2 %v2985_v34  ;;  %765 = vmatpush.msrb.mxu3 %v764_v6  ;;  %v3132_v52 = vand.u32 4294901760, %v3107_v47  ;;  %v3135_v30 = vsub.f32 %v292_v20, %v3109_v41  ;;  %v4202_v53 = vand.u32 4294901760, %v2874_v59  ;;  %v793_v6 = vsub.f32 %v3094_v39, %v792_v14 }
  0x52   : > { %606 = vmatpush.msrb.mxu0 %v4199_v10  ;;  %649 = vmatpush.msrb.mxu1 %v2777_v11  ;;  %v776_v11 = vand.u32 4294901760, %v775_v22  ;;  %v798_v22 = vand.u32 4294901760, %v3120_v21  ;;  %v3146_v16 = vsub.f32 %v290_v36, %v3122_v17  ;;  %v4203_v20 = vand.u32 4294901760, %v2886_v2 }
  0x53   : > { %692 = vmatpush.msrb.mxu2 %v2992_v37  ;;  %4201 = vst [vmem:[#allocation13_spill] sm:$0xff] %v3132_v52  ;;  %771 = vmatpush.msrb.mxu3 %v770_v4  ;;  %v3151_v59 = vsel %vm255_vm2, %v246_v5, 0.0  ;;  %v371_v56 = vsub.f32 %v3107_v47, %v3132_v52  ;;  %v804_v10 = vand.u32 4294901760, %v3135_v30  ;;  %v4205_v4 = vand.u32 4294901760, %v2900_v27 }
  0x54   : > { %610 = vmatpush.msrb.mxu0 %v4200_v42  ;;  %651 = vmatpush.msrb.mxu1 %v2779_v12  ;;  %v782_v12 = vand.u32 4294901760, %v781_v45  ;;  %4204 = vst [vmem:[#allocation14_spill] sm:$0xff] %v3151_v59  ;;  %v3162_v2 = vand.u32 4294901760, %v3151_v59  ;;  %v799_v36 = vsub.f32 %v3120_v21, %v798_v22  ;;  %v810_v45 = vand.u32 4294901760, %v3146_v16 }
  0x55   : > { %694 = vmatpush.msrb.mxu2 %v3006_v48  ;;  %777 = vmatpush.msrb.mxu3 %v776_v11  ;;  %v4207_v42 = vand.u32 4294901760, %v2914_v40  ;;  %v805_v27 = vsub.f32 %v3135_v30, %v804_v10  ;;  %v4208_v11 = vand.u32 4294901760, %v2927_v50 }
  0x56   : > { %614 = vmatpush.msrb.mxu0 %v4202_v53  ;;  %653 = vmatpush.msrb.mxu1 %v2792_v18  ;;  %v788_v18 = vand.u32 4294901760, %v787_v31  ;;  %4206 = vst [vmem:[#allocation15_spill] sm:$0xff] %v3162_v2  ;;  %v800_v40 = vand.u32 4294901760, %v799_v36  ;;  %v3186_v5 = vsub.f32 %v3151_v59, %v3162_v2  ;;  %v4210_v31 = vand.u32 4294901760, %v2934_v57 }
  0x57   : > { %696 = vmatpush.msrb.mxu2 %v3022_v62  ;;  %783 = vmatpush.msrb.mxu3 %v782_v12  ;;  %v4213_v57 = vand.u32 4294901760, %v2919_v44  ;;  %v4223_v36 = vand.u32 4294901760, %v3000_v25 }
  0x58   : > { %618 = vmatpush.msrb.mxu0 %v4203_v20  ;;  %655 = vmatpush.msrb.mxu1 %v2808_v26  ;;  %v794_v26 = vand.u32 4294901760, %v793_v6  ;;  %4209 = vst [vmem:[#allocation16_spill] sm:$0xff] %v3186_v5  ;;  %v3197_v53 = vand.u32 4294901760, %v3186_v5  ;;  %v4215_v6 = vld [vmem:[#allocation11_spill] sm:$0xff] }
  0x59   : > { %698 = vmatpush.msrb.mxu2 %v3042_v33  ;;  %789 = vmatpush.msrb.mxu3 %v788_v18  ;;  %v4217_v20 = vld [vmem:[#allocation7_spill] sm:$0xff]  ;;  %v4218_v18 = vld [vmem:[#allocation9_spill] sm:$0xff] }
  0x5a   : > { %622 = vmatpush.msrb.mxu0 %v4205_v4  ;;  %657 = vmatpush.msrb.mxu1 %v2812_v29  ;;  %v3172_v29 = vand.u32 4294901760, %v371_v56  ;;  %4211 = vst [vmem:[#allocation17_spill] sm:$0xff] %v3197_v53  ;;  %v712_v12 = vsub.f32 %v3186_v5, %v3197_v53  ;;  %v4222_v4 = vand.u32 4294901760, %v2978_v61 }
  0x5b   : > { %700 = vmatpush.msrb.mxu2 %v3055_v23  ;;  %795 = vmatpush.msrb.mxu3 %v794_v26  ;;  %v2670_v26 = vmov 0  }
  0x5c   : > { %626 = vmatpush.msrb.mxu0 %v4207_v42  ;;  %659 = vmatpush.msrb.mxu1 %v2830_v35  ;;  %v811_v35 = vsub.f32 %v3146_v16, %v810_v45  ;;  %v3218_v56 = vand.u32 4294901760, %v712_v12 }
  0x5d   : > { %702 = vmatpush.msrb.mxu2 %v3068_v13  ;;  %373 = vmatmul.f32.vlgmr.msra.gmra.mxu0 %v3172_v29 }
  0x5e   : > { %630 = vmatpush.msrb.mxu0 %v4208_v11  ;;  %661 = vmatpush.msrb.mxu1 %v2849_v46  ;;  %v806_v46 = vand.u32 4294901760, %v805_v27  ;;  %v812_v50 = vand.u32 4294901760, %v811_v35 }
  0x5f   : > { %704 = vmatpush.msrb.mxu2 %v3091_v9  ;;  %801 = vmatpush.msrb.mxu3 %v800_v40 }
  0x60   : > { %634 = vmatpush.msrb.mxu0 %v4210_v31  ;;  %663 = vmatpush.msrb.mxu1 %v2858_v51  ;;  %v4212_v51 = vld [vmem:[#allocation10_spill] sm:$0xff]  ;;  %v271_v31 = vld [vmem:[#allocation3 + $0x68] sm:$0xff] }
  0x61   : > { %706 = vmatpush.msrb.mxu2 %v3109_v41  ;;  %807 = vmatpush.msrb.mxu3 %v806_v46  ;;  %4220 = vst [vmem:[#allocation10_spill] sm:$0xff] %v3218_v56 }
  0x62   : > { %821 = vmatpush.msra.mxu0 %v2919_v44  ;;  %665 = vmatpush.msrb.mxu1 %v2871_v58  ;;  %v4214_v58 = vld [vmem:[#allocation8_spill] sm:$0xff]  ;;  %v4219_v44 = vand.u32 4294901760, %v4212_v51 }
  0x63   : > { %708 = vmatpush.msrb.mxu2 %v3122_v17  ;;  %813 = vmatpush.msrb.mxu3 %v812_v50 }
  0x64   : > { %824 = vmatpush.msra.mxu0 %v2937_v60  ;;  %667 = vmatpush.msrb.mxu1 %v2882_v0  ;;  %v4216_v0 = vand.u32 4294901760, %v2937_v60  ;;  %v4221_v60 = vand.u32 4294901760, %v4215_v6 }
  0x65   : > { %528 = vmatmul.f32.vlgmr.msra.gmra.mxu2 %v3107_v47  ;;  %567 = vmatmul.f32.vlgmr.msra.gmra.mxu3 %v3132_v52 }
  0x66   : > { %827 = vmatpush.msra.mxu0 %v4212_v51  ;;  %915 = vmatpush.msra.mxu2 %v4213_v57 }
  0x67   : > { %669 = vmatpush.msrb.mxu1 %v4214_v58  ;;  %982 = vmatpush.msra.mxu3 %v4217_v20  ;;  %v269_v58 = vld [vmem:[#allocation3 + $0x58] sm:$0xff] }
  0x68   : > { %830 = vmatpush.msra.mxu0 %v4215_v6  ;;  %919 = vmatpush.msra.mxu2 %v4216_v0  ;;  %v3372_v6 = vand.u32 4294901760, %v271_v31 }
  0x69   : > { %671 = vmatpush.msrb.mxu1 %v4218_v18  ;;  %984 = vmatpush.msra.mxu3 %v2906_v32  ;;  %v267_v18 = vld [vmem:[#allocation3 + $0x48] sm:$0xff] }
  0x6a   : > { %833 = vmatpush.msra.mxu0 %v2978_v61  ;;  %474 = vmatmul.f32.vlgmr.msra.gmra.mxu1 %v3081_v63 }
  0x6b   : > { %923 = vmatpush.msra.mxu2 %v4219_v44  ;;  %874 = vmatpush.msra.mxu1 %v4217_v20 }
  0x6c   : > { %836 = vmatpush.msra.mxu0 %v3000_v25  ;;  %986 = vmatpush.msra.mxu3 %v2929_v55  ;;  %v4225_v25 = vand.u32 4294901760, %v3020_v43 }
  0x6d   : > { %927 = vmatpush.msra.mxu2 %v4221_v60  ;;  %876 = vmatpush.msra.mxu1 %v2906_v32  ;;  %v3235_v32 = vld [vmem:[#allocation2] sm:$0xff] }
  0x6e   : > { %714 = vmatmul.f32.vlgmr.msrb.gmra.mxu2 %v3218_v56  ;;  %839 = vmatpush.msra.mxu0 %v3014_v15 }
  0x6f   : > { %878 = vmatpush.msra.mxu1 %v2929_v55  ;;  %931 = vmatpush.msra.mxu2 %v4222_v4  ;;  %v4224_v55 = vand.u32 4294901760, %v3014_v15  ;;  %v3384_v4 = vand.u32 4294901760, %v269_v58 }
  0x70   : > { %988 = vmatpush.msra.mxu3 %v2944_v8  ;;  %2459 = vset.pattern.permute.xlu0 %v2670_v26 }
  0x71   : > { %636 = vmatmul.f32.vlgmr.msrb.gmra.mxu0 %v3081_v63  ;;  %815 = vmatmul.f32.vlgmr.msrb.gmra.mxu3 %v3162_v2 }
  0x72   : > { %842 = vmatpush.msra.mxu0 %v3020_v43  ;;  %880 = vmatpush.msra.mxu1 %v2944_v8  ;;  %v289_v8 = vld [vmem:[#allocation3 + $0xf8] sm:$0xff] }
  0x73   : > { %935 = vmatpush.msra.mxu2 %v4223_v36  ;;  %990 = vmatpush.msra.mxu3 %v2949_v7  ;;  %v3264_v61 = vand.u32 4294901760, %v289_v8  ;;  %v265_v36 = vld [vmem:[#allocation3 + $0x38] sm:$0xff] }
  0x74   : > { %326 = vperm.xlu0 %2459, %v3235_v32   ;;  %673 = vmatmul.f32.vlgmr.msrb.gmra.mxu1 %v3081_v63 }
  0x75   : > { %845 = vmatpush.msra.mxu0 %v3038_v38  ;;  %882 = vmatpush.msra.mxu1 %v2949_v7  ;;  %v4226_v7 = vand.u32 4294901760, %v3038_v38  ;;  %v281_v38 = vld [vmem:[#allocation3 + $0xb8] sm:$0xff] }
  0x76   : > { %939 = vmatpush.msra.mxu2 %v4224_v55  ;;  %992 = vmatpush.msra.mxu3 %v2970_v49 }
  0x77   : > { %848 = vmatpush.msra.mxu0 %v3048_v28  ;;  %884 = vmatpush.msra.mxu1 %v2970_v49  ;;  %v287_v49 = vld [vmem:[#allocation3 + $0xe8] sm:$0xff] }
  0x78   : > { %943 = vmatpush.msra.mxu2 %v4225_v25  ;;  %994 = vmatpush.msra.mxu3 %v2985_v34  ;;  %v3271_v43 = vand.u32 4294901760, %v287_v49 }
  0x79   : > { %851 = vmatpush.msra.mxu0 %v3066_v54  ;;  %886 = vmatpush.msra.mxu1 %v2985_v34  ;;  %v285_v34 = vld [vmem:[#allocation3 + $0xd8] sm:$0xff]  ;;  %v279_v54 = vld [vmem:[#allocation3 + $0xa8] sm:$0xff] }
  0x7a   : > { %947 = vmatpush.msra.mxu2 %v4226_v7  ;;  %996 = vmatpush.msra.mxu3 %v2992_v37  ;;  %v3278_v15 = vand.u32 4294901760, %v285_v34  ;;  %v3291_v28 = vsub.f32 %v287_v49, %v3271_v43  ;;  %v3396_v7 = vsub.f32 %v271_v31, %v3372_v6 }
  0x7b   : > { %854 = vmatpush.msra.mxu0 %v3079_v1  ;;  %888 = vmatpush.msra.mxu1 %v2992_v37  ;;  %v283_v37 = vld [vmem:[#allocation3 + $0xc8] sm:$0xff] }
  0x7c   : > { %951 = vmatpush.msra.mxu2 %v774_v19  ;;  %998 = vmatpush.msra.mxu3 %v3006_v48  ;;  %v3302_v1 = vsub.f32 %v285_v34, %v3278_v15  ;;  %v263_v34 = vld [vmem:[#allocation3 + $0x28] sm:$0xff] }
  0x7d   : > { %857 = vmatpush.msra.mxu0 %v3094_v39  ;;  %890 = vmatpush.msra.mxu1 %v3006_v48  ;;  %v3281_v48 = vsub.f32 %v289_v8, %v3264_v61  ;;  %v4160_v39 = vand.u32 4294901760, %v3291_v28  ;;  %v3393_v8 = vand.u32 4294901760, %v267_v18 }
  0x7e   : > { %955 = vmatpush.msra.mxu2 %v780_v3  ;;  %1000 = vmatpush.msra.mxu3 %v3022_v62  ;;  %v277_v3 = vld [vmem:[#allocation3 + $0x98] sm:$0xff] }
  0x7f   : > { %860 = vmatpush.msra.mxu0 %v3120_v21  ;;  %892 = vmatpush.msra.mxu1 %v3022_v62  ;;  %v3288_v62 = vand.u32 4294901760, %v283_v37  ;;  %v4163_v19 = vand.u32 4294901760, %v3281_v48  ;;  %v4159_v21 = vand.u32 4294901760, %v3302_v1 }
  0x80   : > { %959 = vmatpush.msra.mxu2 %v786_v24  ;;  %1002 = vmatpush.msra.mxu3 %v3042_v33 }
  0x81   : > { %863 = vmatpush.msra.mxu0 %v3135_v30  ;;  %894 = vmatpush.msra.mxu1 %v3042_v33  ;;  %v3298_v33 = vand.u32 4294901760, %v281_v38  ;;  %v3313_v24 = vsub.f32 %v283_v37, %v3288_v62  ;;  %v1074_v11 = vsub.f32 %v3302_v1, %v4159_v21 }
  0x82   : > { %963 = vmatpush.msra.mxu2 %v792_v14  ;;  %1004 = vmatpush.msra.mxu3 %v3055_v23  ;;  %v3323_v14 = vand.u32 4294901760, %v277_v3 }
  0x83   : > { %866 = vmatpush.msra.mxu0 %v3146_v16  ;;  %896 = vmatpush.msra.mxu1 %v3055_v23  ;;  %v3309_v23 = vand.u32 4294901760, %v279_v54  ;;  %v3327_v30 = vsub.f32 %v281_v38, %v3298_v33  ;;  %v4157_v16 = vand.u32 4294901760, %v3313_v24  ;;  %v3402_v38 = vand.u32 4294901760, %v265_v36 }
  0x84   : > { %967 = vmatpush.msra.mxu2 %v798_v22  ;;  %1006 = vmatpush.msra.mxu3 %v3068_v13  ;;  %v275_v22 = vld [vmem:[#allocation3 + $0x88] sm:$0xff]  ;;  %v3351_v35 = vsub.f32 %v277_v3, %v3323_v14 }
  0x85   : > { %869 = vmatmul.f32.vlgmr.msra.gmra.mxu0 %v3186_v5  ;;  %898 = vmatpush.msra.mxu1 %v3068_v13  ;;  %v1062_v13 = vsub.f32 %v3281_v48, %v4163_v19  ;;  %v3342_v42 = vand.u32 4294901760, %v275_v22  ;;  %v4155_v40 = vand.u32 4294901760, %v3327_v30  ;;  %v1080_v50 = vsub.f32 %v3313_v24, %v4157_v16  ;;  %v309_v19 = vld [vmem:[#allocation3 + $0x198] sm:$0xff] }
  0x86   : > { %1019 = vmatpush.msrb.mxu0 %v3264_v61  ;;  %971 = vmatpush.msra.mxu2 %v804_v10  ;;  %v3338_v10 = vsub.f32 %v279_v54, %v3309_v23  ;;  %v4153_v0 = vand.u32 4294901760, %v3351_v35  ;;  %v3405_v54 = vsub.f32 %v269_v58, %v3384_v4  ;;  %v3426_v58 = vsub.f32 %v265_v36, %v3402_v38 }
  0x87   : > { %1008 = vmatpush.msra.mxu3 %v3091_v9  ;;  %900 = vmatpush.msra.mxu1 %v3091_v9  ;;  %v1068_v9 = vsub.f32 %v3291_v28, %v4160_v39  ;;  %v1063_v27 = vand.u32 4294901760, %v1062_v13  ;;  %v3366_v57 = vsub.f32 %v275_v22, %v3342_v42  ;;  %v1086_v12 = vsub.f32 %v3327_v30, %v4155_v40  ;;  %v313_v40 = vld [vmem:[#allocation3 + $0x1b8] sm:$0xff] }
  0x88   : > { %1021 = vmatpush.msrb.mxu0 %v3271_v43  ;;  %975 = vmatpush.msra.mxu2 %v810_v45  ;;  %v273_v45 = vld [vmem:[#allocation3 + $0x78] sm:$0xff]  ;;  %v4154_v51 = vand.u32 4294901760, %v3338_v10  ;;  %v1081_v44 = vand.u32 4294901760, %v1080_v50  ;;  %v1098_v25 = vsub.f32 %v3351_v35, %v4153_v0  ;;  %v3413_v22 = vand.u32 4294901760, %v263_v34 }
  0x89   : > { %1010 = vmatpush.msra.mxu3 %v3109_v41  ;;  %977 = vmatmul.f32.vlgmr.msra.gmra.mxu2 %v3162_v2  ;;  %v1069_v46 = vand.u32 4294901760, %v1068_v9  ;;  %v4151_v26 = vand.u32 4294901760, %v3366_v57  ;;  %v1087_v55 = vand.u32 4294901760, %v1086_v12  ;;  %v4149_v9 = vand.u32 4294901760, %v3396_v7 }
  0x8a   : > { %1023 = vmatpush.msrb.mxu0 %v3278_v15  ;;  %1162 = vmatpush.msrb.mxu2 %v3281_v48  ;;  %v1092_v60 = vsub.f32 %v3338_v10, %v4154_v51  ;;  %v1099_v13 = vand.u32 4294901760, %v1098_v25  ;;  %v4152_v50 = vand.u32 4294901760, %v3405_v54  ;;  %v3438_v36 = vsub.f32 %v263_v34, %v3413_v22  ;;  %v319_v25 = vld [vmem:[#allocation3 + $0x1e8] sm:$0xff] }
  0x8b   : > { %902 = vmatpush.msra.mxu1 %v3109_v41  ;;  %1012 = vmatpush.msra.mxu3 %v3122_v17  ;;  %v3355_v41 = vand.u32 4294901760, %v273_v45  ;;  %v1104_v3 = vsub.f32 %v3366_v57, %v4151_v26  ;;  %v4158_v34 = vand.u32 4294901760, %v3426_v58  ;;  %v315_v26 = vld [vmem:[#allocation3 + $0x1c8] sm:$0xff]  ;;  %v4161_v16 = vmov 3  }
  0x8c   : > { %1014 = vmatmul.f32.vlgmr.msra.gmra.mxu3 %v3162_v2  ;;  %1025 = vmatpush.msrb.mxu0 %v3288_v62  ;;  %v1093_v37 = vand.u32 4294901760, %v1092_v60  ;;  %v4162_v0 = vand.u32 4294901760, %v3438_v36  ;;  %v3490_v39 = vand.u32 4294901760, %v313_v40 }
  0x8d   : > { %1165 = vmatpush.msrb.mxu2 %v3291_v28  ;;  %1215 = vmatpush.msrb.mxu3 %v3264_v61  ;;  %v3378_v20 = vsub.f32 %v273_v45, %v3355_v41  ;;  %v3417_v45 = vsub.f32 %v267_v18, %v3393_v8  ;;  %v1105_v12 = vand.u32 4294901760, %v1104_v3 }
  0x8e   : > { %904 = vmatpush.msra.mxu1 %v3122_v17  ;;  %1027 = vmatpush.msrb.mxu0 %v3298_v33  ;;  %v1075_v17 = vand.u32 4294901760, %v1074_v11  ;;  %v2671_v11 = vmov 2  }
  0x8f   : > { %908 = vmatmul.f32.vlgmr.msra.gmra.mxu1 %v3197_v53  ;;  %1168 = vmatpush.msrb.mxu2 %v3302_v1  ;;  %v4150_v49 = vand.u32 4294901760, %v3378_v20  ;;  %v4156_v60 = vand.u32 4294901760, %v3417_v45  ;;  %v307_v53 = vld [vmem:[#allocation3 + $0x188] sm:$0xff] }
  0x90   : > { %1064 = vmatpush.msrb.mxu1 %v1063_v27  ;;  %1217 = vmatpush.msrb.mxu3 %v3271_v43  ;;  %v261_v27 = vld [vmem:[#allocation3 + $0x18] sm:$0xff]  ;;  %v3536_v56 = vand.u32 4294901760, %v307_v53 }
  0x91   : > { %1029 = vmatpush.msrb.mxu0 %v3309_v23  ;;  %1171 = vmatpush.msrb.mxu2 %v3313_v24  ;;  %v1110_v31 = vsub.f32 %v3378_v20, %v4150_v49  ;;  %v3430_v18 = vand.u32 4294901760, %v261_v27 }
  0x92   : > { %1070 = vmatpush.msrb.mxu1 %v1069_v46  ;;  %1219 = vmatpush.msrb.mxu3 %v3278_v15  ;;  %v321_v46 = vld [vmem:[#allocation3 + $0x1f8] sm:$0xff] }
  0x93   : > { %1031 = vmatpush.msrb.mxu0 %v3323_v14  ;;  %1174 = vmatpush.msrb.mxu2 %v3327_v30  ;;  %v3453_v49 = vsub.f32 %v261_v27, %v3430_v18 }
  0x94   : > { %1076 = vmatpush.msrb.mxu1 %v1075_v17  ;;  %1221 = vmatpush.msrb.mxu3 %v3288_v62  ;;  %v259_v17 = vld [vmem:[#allocation3 + $0x8] sm:$0xff] }
  0x95   : > { %1033 = vmatpush.msrb.mxu0 %v3342_v42  ;;  %1177 = vmatpush.msrb.mxu2 %v3338_v10  ;;  %v3444_v3 = vand.u32 4294901760, %v259_v17 }
  0x96   : > { %1082 = vmatpush.msrb.mxu1 %v1081_v44  ;;  %1223 = vmatpush.msrb.mxu3 %v3298_v33  ;;  %v1116_v44 = vsub.f32 %v3396_v7, %v4149_v9  ;;  %v317_v9 = vld [vmem:[#allocation3 + $0x1d8] sm:$0xff] }
  0x97   : > { %1035 = vmatpush.msrb.mxu0 %v3355_v41  ;;  %1180 = vmatpush.msrb.mxu2 %v3351_v35  ;;  %4227 = vst [vmem:[#allocation8_spill] sm:$0xff] %v3444_v3  ;;  %v3468_v27 = vsub.f32 %v259_v17, %v3444_v3  ;;  %v3470_v51 = vand.u32 4294901760, %v317_v9  ;;  %v4165_v17 = vand.u32 4294901760, %v3453_v49 }
  0x98   : > { %1088 = vmatpush.msrb.mxu1 %v1087_v55  ;;  %1225 = vmatpush.msrb.mxu3 %v3309_v23  ;;  %v3440_v55 = vand.u32 4294901760, %v321_v46 }
  0x99   : > { %2461 = vset.pattern.permute.xlu1 %v2671_v11  ;;  %1037 = vmatpush.msrb.mxu0 %v3372_v6  ;;  %v1122_v11 = vsub.f32 %v3405_v54, %v4152_v50  ;;  %v1128_v50 = vsub.f32 %v3417_v45, %v4156_v60  ;;  %v1134_v60 = vsub.f32 %v3426_v58, %v4158_v34 }
  0x9a   : > { %1718 = vperm.xlu1 %2461, %v3235_v32   ;;  %1094 = vmatpush.msrb.mxu1 %v1093_v37  ;;  %v1111_v37 = vand.u32 4294901760, %v1110_v31  ;;  %v3455_v31 = vand.u32 4294901760, %v319_v25  ;;  %v1140_v34 = vsub.f32 %v3438_v36, %v4162_v0 }
  0x9b   : > { %1183 = vmatpush.msrb.mxu2 %v3366_v57  ;;  %1227 = vmatpush.msrb.mxu3 %v3323_v14 }
  0x9c   : > { %1039 = vmatpush.msrb.mxu0 %v3384_v4  ;;  %1100 = vmatpush.msrb.mxu1 %v1099_v13  ;;  %v2672_v13 = vmov 1   ;;  %4228 = vst [vmem:[#allocation11_spill] sm:$0xff] %v3455_v31 }
  0x9d   : > { %1186 = vmatpush.msrb.mxu2 %v3378_v20  ;;  %1229 = vmatpush.msrb.mxu3 %v3342_v42 }
  0x9e   : > { %2460 = vset.pattern.permute.xlu0 %v2672_v13  ;;  %1041 = vmatpush.msrb.mxu0 %v3393_v8  ;;  %v1117_v13 = vand.u32 4294901760, %v1116_v44  ;;  %v1123_v44 = vand.u32 4294901760, %v1122_v11  ;;  %v1129_v11 = vand.u32 4294901760, %v1128_v50  ;;  %v1135_v50 = vand.u32 4294901760, %v1134_v60 }
  0x9f   : > { %1106 = vmatpush.msrb.mxu1 %v1105_v12  ;;  %1189 = vmatpush.msrb.mxu2 %v3396_v7  ;;  %v3464_v12 = vsub.f32 %v321_v46, %v3440_v55  ;;  %v3477_v46 = vand.u32 4294901760, %v315_v26  ;;  %v1141_v60 = vand.u32 4294901760, %v1140_v34  ;;  %v4230_v34 = vand.u32 4294901760, %v3281_v48 }
  0xa0   : > { %1231 = vmatpush.msrb.mxu3 %v3355_v41  ;;  %1703 = vperm.xlu0 %2460, %v3235_v32   ;;  %v4232_v48 = vand.u32 4294901760, %v3291_v28  ;;  %v4234_v28 = vand.u32 4294901760, %v3302_v1  ;;  %v4236_v1 = vand.u32 4294901760, %v3313_v24  ;;  %v4238_v24 = vand.u32 4294901760, %v3327_v30 }
  0xa1   : > { %1043 = vmatpush.msrb.mxu0 %v3402_v38  ;;  %1112 = vmatpush.msrb.mxu1 %v1111_v37  ;;  %v3483_v37 = vsub.f32 %v319_v25, %v3455_v31  ;;  %v4168_v21 = vand.u32 4294901760, %v3464_v12  ;;  %v3500_v0 = vsub.f32 %v315_v26, %v3477_v46  ;;  %v4240_v30 = vand.u32 4294901760, %v3338_v10 }
  0xa2   : > { %1192 = vmatpush.msrb.mxu2 %v3405_v54  ;;  %1233 = vmatpush.msrb.mxu3 %v3372_v6  ;;  %v4241_v10 = vand.u32 4294901760, %v3351_v35 }
  0xa3   : > { %2462 = vset.pattern.permute.xlu1 %v4161_v16  ;;  %1045 = vmatpush.msrb.mxu0 %v3413_v22  ;;  %v311_v16 = vld [vmem:[#allocation3 + $0x1a8] sm:$0xff]  ;;  %v1403_v26 = vsub.f32 %v3464_v12, %v4168_v21  ;;  %v305_v21 = vld [vmem:[#allocation3 + $0x178] sm:$0xff]  ;;  %v4231_v2 = vand.u32 4294901760, %v3483_v37 }
  0xa4   : > { %1118 = vmatpush.msrb.mxu1 %v1117_v13  ;;  %1195 = vmatpush.msrb.mxu2 %v3417_v45  ;;  %v3496_v13 = vsub.f32 %v317_v9, %v3470_v51  ;;  %v3508_v9 = vand.u32 4294901760, %v311_v16  ;;  %v3549_v52 = vand.u32 4294901760, %v305_v21 }
  0xa5   : > { %1235 = vmatpush.msrb.mxu3 %v3384_v4  ;;  %1733 = vperm.xlu1 %2462, %v3235_v32   ;;  %v1146_v32 = vsub.f32 %v3453_v49, %v4165_v17  ;;  %v4229_v17 = vand.u32 4294901760, %v3468_v27 }
  0xa6   : > { %1047 = vmatpush.msrb.mxu0 %v3430_v18  ;;  %1124 = vmatpush.msrb.mxu1 %v1123_v44  ;;  %v3515_v44 = vsub.f32 %v313_v40, %v3490_v39  ;;  %v3534_v59 = vsub.f32 %v311_v16, %v3508_v9  ;;  %v303_v40 = vld [vmem:[#allocation3 + $0x168] sm:$0xff] }
  0xa7   : > { %1198 = vmatpush.msrb.mxu2 %v3426_v58  ;;  %1237 = vmatpush.msrb.mxu3 %v3393_v8  ;;  %v1152_v25 = vsub.f32 %v3468_v27, %v4229_v17  ;;  %v1147_v5 = vand.u32 4294901760, %v1146_v32  ;;  %v1409_v17 = vsub.f32 %v3483_v37, %v4231_v2  ;;  %v4233_v2 = vand.u32 4294901760, %v3496_v13 }
  0xa8   : > { %1049 = vmatpush.msrb.mxu0 %v3444_v3  ;;  %1130 = vmatpush.msrb.mxu1 %v1129_v11  ;;  %v3523_v11 = vand.u32 4294901760, %v309_v19 }
  0xa9   : > { %1201 = vmatpush.msrb.mxu2 %v3438_v36  ;;  %1239 = vmatpush.msrb.mxu3 %v3402_v38  ;;  %v1153_v32 = vand.u32 4294901760, %v1152_v25  ;;  %v1415_v16 = vsub.f32 %v3496_v13, %v4233_v2  ;;  %v1410_v25 = vand.u32 4294901760, %v1409_v17 }
  0xaa   : > { %1256 = vmatpush.msra.mxu0 %v4230_v34  ;;  %1136 = vmatpush.msrb.mxu1 %v1135_v50  ;;  %v1404_v50 = vand.u32 4294901760, %v1403_v26  ;;  %v3547_v63 = vsub.f32 %v309_v19, %v3523_v11  ;;  %v3560_v19 = vsub.f32 %v307_v53, %v3536_v56  ;;  %v3562_v34 = vand.u32 4294901760, %v303_v40 }
  0xab   : > { %1204 = vmatpush.msrb.mxu2 %v3453_v49  ;;  %1241 = vmatpush.msrb.mxu3 %v3413_v22  ;;  %v1416_v17 = vand.u32 4294901760, %v1415_v16  ;;  %v3572_v53 = vsub.f32 %v305_v21, %v3549_v52 }
  0xac   : > { %1260 = vmatpush.msra.mxu0 %v4232_v48  ;;  %1142 = vmatpush.msrb.mxu1 %v1141_v60  ;;  %v4235_v60 = vand.u32 4294901760, %v3500_v0  ;;  %v301_v48 = vld [vmem:[#allocation3 + $0x158] sm:$0xff]  ;;  %v4179_v2 = vand.u32 4294901760, %v3547_v63  ;;  %v1444_v16 = vand.u32 4294901760, %v3560_v19  ;;  %v3585_v21 = vsub.f32 %v303_v40, %v3562_v34 }
  0xad   : > { %1207 = vmatpush.msrb.mxu2 %v3468_v27  ;;  %1243 = vmatpush.msrb.mxu3 %v3430_v18 }
  0xae   : > { %1264 = vmatpush.msra.mxu0 %v4234_v28  ;;  %v1421_v26 = vsub.f32 %v3500_v0, %v4235_v60  ;;  %1148 = vmatpush.msrb.mxu1 %v1147_v5  ;;  %v4237_v28 = vand.u32 4294901760, %v3515_v44  ;;  %v299_v5 = vld [vmem:[#allocation3 + $0x148] sm:$0xff] }
  0xaf   : > { %1360 = vmatpush.msra.mxu2 %v3440_v55  ;;  %1245 = vmatpush.msrb.mxu3 %v3444_v3  ;;  %v3574_v3 = vand.u32 4294901760, %v301_v48 }
  0xb0   : > { %1268 = vmatpush.msra.mxu0 %v4236_v1  ;;  %v1427_v60 = vsub.f32 %v3515_v44, %v4237_v28  ;;  %1154 = vmatpush.msrb.mxu1 %v1153_v32  ;;  %v1422_v1 = vand.u32 4294901760, %v1421_v26  ;;  %v3587_v28 = vand.u32 4294901760, %v299_v5  ;;  %v1439_v26 = vsub.f32 %v3547_v63, %v4179_v2 }
  0xb1   : > { %1362 = vmatpush.msra.mxu2 %v3455_v31  ;;  %1405 = vmatpush.msra.mxu3 %v1404_v50  ;;  %v297_v31 = vld [vmem:[#allocation3 + $0x138] sm:$0xff]  ;;  %v4239_v50 = vand.u32 4294901760, %v3534_v59  ;;  %v3598_v40 = vsub.f32 %v301_v48, %v3574_v3  ;;  %v4242_v2 = vand.u32 4294901760, %v3366_v57  ;;  %v4243_v57 = vand.u32 4294901760, %v3378_v20 }
  0xb2   : > { %1272 = vmatpush.msra.mxu0 %v4238_v24  ;;  %1323 = vmatpush.msra.mxu1 %v3264_v61  ;;  %v1428_v61 = vand.u32 4294901760, %v1427_v60  ;;  %v3600_v24 = vand.u32 4294901760, %v297_v31  ;;  %v1445_v60 = vsub.f32 %v3560_v19, %v1444_v16  ;;  %v3611_v48 = vsub.f32 %v299_v5, %v3587_v28 }
  0xb3   : > { %1364 = vmatpush.msra.mxu2 %v3470_v51  ;;  %1411 = vmatpush.msra.mxu3 %v1410_v25  ;;  %v1433_v32 = vsub.f32 %v3534_v59, %v4239_v50  ;;  %v1450_v25 = vand.u32 4294901760, %v3572_v53  ;;  %v295_v50 = vld [vmem:[#allocation3 + $0x128] sm:$0xff]  ;;  %v1440_v35 = vand.u32 4294901760, %v1439_v26 }
  0xb4   : > { %1276 = vmatpush.msra.mxu0 %v4240_v30  ;;  %1325 = vmatpush.msra.mxu1 %v3271_v43  ;;  %v293_v30 = vld [vmem:[#allocation3 + $0x118] sm:$0xff]  ;;  %v3624_v5 = vsub.f32 %v297_v31, %v3600_v24  ;;  %v1468_v26 = vand.u32 4294901760, %v3611_v48  ;;  %v4244_v31 = vand.u32 4294901760, %v3396_v7  ;;  %v4245_v7 = vand.u32 4294901760, %v3405_v54 }
  0xb5   : > { %1366 = vmatpush.msra.mxu2 %v3477_v46  ;;  %1417 = vmatpush.msra.mxu3 %v1416_v17  ;;  %v1434_v43 = vand.u32 4294901760, %v1433_v32  ;;  %v1456_v17 = vand.u32 4294901760, %v3585_v21  ;;  %v1462_v32 = vand.u32 4294901760, %v3598_v40 }
  0xb6   : > { %1280 = vmatpush.msra.mxu0 %v4241_v10  ;;  %1327 = vmatpush.msra.mxu1 %v3278_v15  ;;  %v3616_v15 = vand.u32 4294901760, %v295_v50  ;;  %v291_v10 = vld [vmem:[#allocation3 + $0x108] sm:$0xff] }
  0xb7   : > { %1368 = vmatpush.msra.mxu2 %v3490_v39  ;;  %1423 = vmatpush.msra.mxu3 %v1422_v1  ;;  %v1451_v1 = vsub.f32 %v3572_v53, %v1450_v25 }
  0xb8   : > { %1284 = vmatpush.msra.mxu0 %v4242_v2  ;;  %1329 = vmatpush.msra.mxu1 %v3288_v62  ;;  %v3629_v62 = vand.u32 4294901760, %v293_v30  ;;  %v1446_v2 = vand.u32 4294901760, %v1445_v60  ;;  %v3640_v20 = vsub.f32 %v295_v50, %v3616_v15  ;;  %v1463_v60 = vsub.f32 %v3598_v40, %v1462_v32 }
  0xb9   : > { %1370 = vmatpush.msra.mxu2 %v3508_v9  ;;  %1429 = vmatpush.msra.mxu3 %v1428_v61  ;;  %v1457_v61 = vsub.f32 %v3585_v21, %v1456_v17 }
  0xba   : > { %1288 = vmatpush.msra.mxu0 %v4243_v57  ;;  %1331 = vmatpush.msra.mxu1 %v3298_v33  ;;  %v3642_v33 = vand.u32 4294901760, %v291_v10  ;;  %v1474_v57 = vand.u32 4294901760, %v3624_v5  ;;  %v1480_v54 = vand.u32 4294901760, %v3640_v20 }
  0xbb   : > { %1372 = vmatpush.msra.mxu2 %v3523_v11  ;;  %1435 = vmatpush.msra.mxu3 %v1434_v43  ;;  %v1452_v43 = vand.u32 4294901760, %v1451_v1  ;;  %v1458_v50 = vand.u32 4294901760, %v1457_v61  ;;  %v4246_v1 = vand.u32 4294901760, %v3417_v45  ;;  %v4247_v61 = vand.u32 4294901760, %v3426_v58 }
  0xbc   : > { %1292 = vmatpush.msra.mxu0 %v4244_v31  ;;  %1333 = vmatpush.msra.mxu1 %v3309_v23  ;;  %v3653_v23 = vsub.f32 %v293_v30, %v3629_v62  ;;  %v1464_v30 = vand.u32 4294901760, %v1463_v60  ;;  %v1481_v31 = vsub.f32 %v3640_v20, %v1480_v54 }
  0xbd   : > { %1374 = vmatpush.msra.mxu2 %v3536_v56  ;;  %1441 = vmatpush.msra.mxu3 %v1440_v35  ;;  %v1469_v35 = vsub.f32 %v3611_v48, %v1468_v26 }
  0xbe   : > { %1296 = vmatpush.msra.mxu0 %v4245_v7  ;;  %1335 = vmatpush.msra.mxu1 %v3323_v14  ;;  %v3664_v14 = vsub.f32 %v291_v10, %v3642_v33  ;;  %v4248_v10 = vand.u32 4294901760, %v3438_v36  ;;  %v1482_v60 = vand.u32 4294901760, %v1481_v31  ;;  %v4259_v7 = vld [vmem:[#allocation10_spill] sm:$0xff] }
  0xbf   : > { %1376 = vmatpush.msra.mxu2 %v3549_v52  ;;  %1447 = vmatpush.msra.mxu3 %v1446_v2  ;;  %v1475_v2 = vsub.f32 %v3624_v5, %v1474_v57  ;;  %v1470_v45 = vand.u32 4294901760, %v1469_v35 }
  0xc0   : > { %1300 = vmatpush.msra.mxu0 %v4246_v1  ;;  %1337 = vmatpush.msra.mxu1 %v3342_v42  ;;  %v1486_v42 = vand.u32 4294901760, %v3653_v23  ;;  %v1492_v58 = vand.u32 4294901760, %v3664_v14  ;;  %v2229_v1 = vld [vmem:[%s4118_s1 + $0x1] ss:$8 sm:$0x3] }
  0xc1   : > { %1378 = vmatpush.msra.mxu2 %v3562_v34  ;;  %1453 = vmatpush.msra.mxu3 %v1452_v43  ;;  %v4249_v43 = vand.u32 4294901760, %v3453_v49 }
  0xc2   : > { %1304 = vmatpush.msra.mxu0 %v4247_v61  ;;  %1339 = vmatpush.msra.mxu1 %v3355_v41  ;;  %v1476_v41 = vand.u32 4294901760, %v1475_v2  ;;  %v1487_v36 = vsub.f32 %v3653_v23, %v1486_v42  ;;  %v1493_v49 = vsub.f32 %v3664_v14, %v1492_v58 }
  0xc3   : > { %1380 = vmatpush.msra.mxu2 %v3574_v3  ;;  %1459 = vmatpush.msra.mxu3 %v1458_v50 }
  0xc4   : > { %1308 = vmatpush.msra.mxu0 %v4248_v10  ;;  %1341 = vmatpush.msra.mxu1 %v3372_v6  ;;  %v4250_v6 = vand.u32 4294901760, %v3468_v27  ;;  %v4254_v27 = vld [vmem:[#allocation8_spill] sm:$0xff] }
  0xc5   : > { %1382 = vmatpush.msra.mxu2 %v3587_v28  ;;  %1465 = vmatpush.msra.mxu3 %v1464_v30 }
  0xc6   : > { %1312 = vmatpush.msra.mxu0 %v4249_v43  ;;  %1343 = vmatpush.msra.mxu1 %v3384_v4  ;;  %v1488_v4 = vand.u32 4294901760, %v1487_v36 }
  0xc7   : > { %1384 = vmatpush.msra.mxu2 %v3600_v24  ;;  %1471 = vmatpush.msra.mxu3 %v1470_v45  ;;  %v1708_v45 = vperm.slane %v2229_v1, 1 }
  0xc8   : > { %1316 = vmatpush.msra.mxu0 %v4250_v6  ;;  %1345 = vmatpush.msra.mxu1 %v3393_v8  ;;  %v1494_v8 = vand.u32 4294901760, %v1493_v49 }
  0xc9   : > { %1386 = vmatpush.msra.mxu2 %v3616_v15  ;;  %1477 = vmatpush.msra.mxu3 %v1476_v41 }
  0xca   : > { %1055 = vmatmul.f32.vlgmr.msrb.gmra.mxu0 %v3172_v29  ;;  %1347 = vmatpush.msra.mxu1 %v3402_v38  ;;  %v4251_v29 = vand.u32 4294901760, %v3464_v12  ;;  %v4252_v38 = vld [vmem:[#allocation13_spill] sm:$0xff] }
  0xcb   : > { %1503 = vmatpush.msrb.mxu0 %v3464_v12  ;;  %1388 = vmatpush.msra.mxu2 %v3629_v62  ;;  %v4256_v12 = vand.u32 4294901760, %v3496_v13 }
  0xcc   : > { %1483 = vmatpush.msra.mxu3 %v1482_v60  ;;  %1349 = vmatpush.msra.mxu1 %v3413_v22  ;;  %v4253_v22 = vand.u32 4294901760, %v3483_v37 }
  0xcd   : > { %1506 = vmatpush.msrb.mxu0 %v3483_v37  ;;  %1390 = vmatpush.msra.mxu2 %v3642_v33  ;;  %v4258_v37 = vand.u32 4294901760, %v3500_v0 }
  0xce   : > { %1489 = vmatpush.msra.mxu3 %v1488_v4  ;;  %1210 = vmatmul.f32.vlgmr.msrb.gmra.mxu2 %v3107_v47  ;;  %v4255_v47 = vld [vmem:[#allocation12_spill] sm:$0xff] }
  0xcf   : > { %1509 = vmatpush.msrb.mxu0 %v3496_v13  ;;  %1597 = vmatpush.msrb.mxu2 %v4251_v29  ;;  %v4260_v13 = vand.u32 4294901760, %v3515_v44 }
  0xd0   : > { %1351 = vmatpush.msra.mxu1 %v3430_v18  ;;  %1495 = vmatpush.msra.mxu3 %v1494_v8  ;;  %v4257_v18 = vld [vmem:[#allocation11_spill] sm:$0xff] }
  0xd1   : > { %1249 = vmatmul.f32.vlgmr.msrb.gmra.mxu3 %v4252_v38  ;;  %1512 = vmatpush.msrb.mxu0 %v3500_v0  ;;  %v4262_v0 = vand.u32 4294901760, %v3534_v59 }
  0xd2   : > { %1601 = vmatpush.msrb.mxu2 %v4253_v22  ;;  %1664 = vmatpush.msrb.mxu3 %v3440_v55 }
  0xd3   : > { %1353 = vmatpush.msra.mxu1 %v4254_v27  ;;  %1515 = vmatpush.msrb.mxu0 %v3515_v44 }
  0xd4   : > { %1156 = vmatmul.f32.vlgmr.msrb.gmra.mxu1 %v4255_v47  ;;  %1605 = vmatpush.msrb.mxu2 %v4256_v12 }
  0xd5   : > { %1556 = vmatpush.msrb.mxu1 %v3440_v55  ;;  %1666 = vmatpush.msrb.mxu3 %v4257_v18  ;;  %v4261_v55 = vld [vmem:[#allocation15_spill] sm:$0xff] }
  0xd6   : > { %1518 = vmatpush.msrb.mxu0 %v3534_v59  ;;  %1609 = vmatpush.msrb.mxu2 %v4258_v37 }
  0xd7   : > { %1558 = vmatpush.msrb.mxu1 %v4257_v18  ;;  %1668 = vmatpush.msrb.mxu3 %v3470_v51 }
  0xd8   : > { %1396 = vmatmul.f32.vlgmr.msra.gmra.mxu2 %v4259_v7  ;;  %1521 = vmatpush.msrb.mxu0 %v3547_v63 }
  0xd9   : > { %1560 = vmatpush.msrb.mxu1 %v3470_v51  ;;  %1613 = vmatpush.msrb.mxu2 %v4260_v13  ;;  %v4263_v51 = vand.u32 4294901760, %v3547_v63  ;;  %v323_v63 = vld [vmem:[%s4118_s1] ss:$8 sm:$0x3] }
  0xda   : > { %1670 = vmatpush.msrb.mxu3 %v3477_v46  ;;  %1318 = vmatmul.f32.vlgmr.msra.gmra.mxu0 %v4255_v47  ;;  %v331_v59 = vperm.slane %v323_v63, 1 }
  0xdb   : > { %1497 = vmatmul.f32.vlgmr.msra.gmra.mxu3 %v4261_v55  ;;  %1524 = vmatpush.msrb.mxu0 %v3560_v19 }
  0xdc   : > { %1562 = vmatpush.msrb.mxu1 %v3477_v46  ;;  %1617 = vmatpush.msrb.mxu2 %v4262_v0 }
  0xdd   : > { %1672 = vmatpush.msrb.mxu3 %v3490_v39  ;;  %1355 = vmatmul.f32.vlgmr.msra.gmra.mxu1 %v4255_v47 }
  0xde   : > { %1527 = vmatpush.msrb.mxu0 %v3572_v53  ;;  %1564 = vmatpush.msrb.mxu1 %v3490_v39  ;;  %v330_v39 = vperm.slane %v323_v63, 0 }
  0xdf   : > { %1621 = vmatpush.msrb.mxu2 %v4263_v51  ;;  %1674 = vmatpush.msrb.mxu3 %v3508_v9 }
  0xe0   : > { %1530 = vmatpush.msrb.mxu0 %v3585_v21  ;;  %1566 = vmatpush.msrb.mxu1 %v3508_v9  ;;  %v4267_v21 = vld [vmem:[#allocation17_spill] sm:$0xff] }
  0xe1   : > { %1625 = vmatpush.msrb.mxu2 %v1444_v16  ;;  %1676 = vmatpush.msrb.mxu3 %v3523_v11  ;;  %v4266_v16 = vmov 3  }
  0xe2   : > { %1533 = vmatpush.msrb.mxu0 %v3598_v40  ;;  %1568 = vmatpush.msrb.mxu1 %v3523_v11  ;;  %v4264_v11 = vld [vmem:[#allocation16_spill] sm:$0xff] }
  0xe3   : > { %1629 = vmatpush.msrb.mxu2 %v1450_v25  ;;  %1678 = vmatpush.msrb.mxu3 %v3536_v56 }
  0xe4   : > { %1536 = vmatpush.msrb.mxu0 %v3611_v48  ;;  %1570 = vmatpush.msrb.mxu1 %v3536_v56 }
  0xe5   : > { %1633 = vmatpush.msrb.mxu2 %v1456_v17  ;;  %1680 = vmatpush.msrb.mxu3 %v3549_v52 }
  0xe6   : > { %1539 = vmatpush.msrb.mxu0 %v3624_v5  ;;  %1572 = vmatpush.msrb.mxu1 %v3549_v52  ;;  %v327_v46 = vpop.permute.xlu0 %326  ;;  %v374_v52 = vpop.f32.mrf.mxu0 }
  0xe7   : > { %1637 = vmatpush.msrb.mxu2 %v1462_v32  ;;  %1682 = vmatpush.msrb.mxu3 %v3562_v34  ;;  %v3768_v9 = vmul.f32 %v331_v59, %v327_v46  ;;  %v334_v56 = vmul.f32 %v330_v39, %v327_v46 }
  0xe8   : > { %1542 = vmatpush.msrb.mxu0 %v3640_v20  ;;  %1574 = vmatpush.msrb.mxu1 %v3562_v34  ;;  %v4265_v34 = vld [vmem:[#allocation14_spill] sm:$0xff]  ;;  %v529_v53 = vpop.f32.mrf.mxu2  ;;  %v568_v25 = vpop.f32.mrf.mxu3 }
  0xe9   : > { %1641 = vmatpush.msrb.mxu2 %v1468_v26  ;;  %1684 = vmatpush.msrb.mxu3 %v3574_v3  ;;  %v375_v44 = vadd.f32 %v374_v52, %v334_v56  ;;  %v2230_v20 = vld [vmem:[%s4118_s1 + $0x2] ss:$8 sm:$0x3] }
  0xea   : > { %1545 = vmatpush.msrb.mxu0 %v3653_v23  ;;  %1576 = vmatpush.msrb.mxu1 %v3574_v3  ;;  %v475_v3 = vpop.f32.mrf.mxu1  ;;  %v1722_v2 = vperm.slane %v2230_v20, 0 }
  0xeb   : > { %1645 = vmatpush.msrb.mxu2 %v1474_v57  ;;  %1686 = vmatpush.msrb.mxu3 %v3587_v28  ;;  %v476_v19 = vadd.f32 %v475_v3, %v375_v44  ;;  %v1723_v57 = vperm.slane %v2230_v20, 1 }
  0xec   : > { %1548 = vmatpush.msrb.mxu0 %v3664_v14  ;;  %1578 = vmatpush.msrb.mxu1 %v3587_v28 }
  0xed   : > { %1649 = vmatpush.msrb.mxu2 %v1480_v54  ;;  %1688 = vmatpush.msrb.mxu3 %v3600_v24  ;;  %v530_v28 = vadd.f32 %v529_v53, %v476_v19 }
  0xee   : > { %1551 = vmatmul.f32.vlgmr.msrb.gmra.mxu0 %v4264_v11  ;;  %1580 = vmatpush.msrb.mxu1 %v3600_v24  ;;  %v637_v24 = vpop.f32.mrf.mxu0 }
  0xef   : > { %1653 = vmatpush.msrb.mxu2 %v1486_v42  ;;  %1690 = vmatpush.msrb.mxu3 %v3616_v15  ;;  %v569_v40 = vadd.f32 %v568_v25, %v530_v28  ;;  %v1707_v42 = vperm.slane %v2229_v1, 0 }
  0xf0   : > { %1582 = vmatpush.msrb.mxu1 %v3616_v15  ;;  %1746 = vrot.lane.b32.xlu2 %v4265_v34, %s2674_s22 }
  0xf1   : > { %1657 = vmatpush.msrb.mxu2 %v1492_v58  ;;  %1692 = vmatpush.msrb.mxu3 %v3629_v62  ;;  %v638_v17 = vadd.f32 %v637_v24, %v569_v40  ;;  %v715_v32 = vpop.f32.mrf.mxu2  ;;  %v2231_v58 = vld [vmem:[%s4118_s1 + $0x3] ss:$8 sm:$0x3] }
  0xf2   : > { %1659 = vmatmul.f32.vlgmr.msrb.gmra.mxu2 %v4261_v55  ;;  %1584 = vmatpush.msrb.mxu1 %v3629_v62  ;;  %v674_v48 = vpop.f32.mrf.mxu1  ;;  %v1737_v60 = vperm.slane %v2231_v58, 0 }
  0xf3   : > { %1694 = vmatpush.msrb.mxu3 %v3642_v33  ;;  %2463 = vset.pattern.permute.xlu0 %v4266_v16  ;;  %v675_v15 = vadd.f32 %v674_v48, %v638_v17  ;;  %v1738_v16 = vperm.slane %v2231_v58, 1 }
  0xf4   : > { %1696 = vmatmul.f32.vlgmr.msrb.gmra.mxu3 %v4261_v55  ;;  %1586 = vmatpush.msrb.mxu1 %v3642_v33  ;;  %v816_v62 = vpop.f32.mrf.mxu3 }
  0xf5   : > { %1590 = vmatmul.f32.vlgmr.msrb.gmra.mxu1 %v4267_v21  ;;  %v716_v5 = vadd.f32 %v715_v32, %v675_v15 }
  0xf7   : > { %v817_v33 = vadd.f32 %v816_v62, %v716_v5 }
  0xf8   : > { %1751 = vrot.lane.b32.xlu2 %v4265_v34, %s2675_s24 }
 0x102   : > { %v870_v26 = vpop.f32.mrf.mxu0 }
 0x103   : > { %v871_v23 = vadd.f32 %v870_v26, %v817_v33 }
 0x10c   : > { %v1719_v50 = vpop.permute.xlu1 %1718  ;;  %v909_v35 = vpop.f32.mrf.mxu1 }
 0x10d   : > { %v1727_v54 = vmul.f32 %v1723_v57, %v1719_v50  ;;  %v910_v14 = vadd.f32 %v909_v35, %v871_v23  ;;  %v978_v30 = vpop.f32.mrf.mxu2  ;;  %v1726_v43 = vmul.f32 %v1722_v2, %v1719_v50 }
 0x10f   : > { %v979_v61 = vadd.f32 %v978_v30, %v910_v14  ;;  %v1015_v10 = vpop.f32.mrf.mxu3 }
 0x111   : > { %v1016_v31 = vadd.f32 %v1015_v10, %v979_v61 }
 0x112   : > { %v1704_v41 = vpop.permute.xlu0 %1703 }
 0x113   : > { %v1711_v36 = vmul.f32 %v1707_v42, %v1704_v41  ;;  %v1712_v6 = vmul.f32 %v1708_v45, %v1704_v41 }
 0x115   : > { %v1713_v49 = vadd.f32 %v1711_v36, %v1016_v31 }
 0x117   : > { %v1728_v4 = vadd.f32 %v1726_v43, %v1713_v49  ;;  %v1734_v8 = vpop.permute.xlu1 %1733 }
 0x118   : > { %v1741_v29 = vmul.f32 %v1737_v60, %v1734_v8  ;;  %v1742_v40 = vmul.f32 %v1738_v16, %v1734_v8 }
 0x11a   : > { %v1743_v38 = vadd.f32 %v1741_v29, %v1728_v4 }
 0x11c   : > { %v1767_v22 = vmax.f32 %v1743_v38, 0.0 }
 0x11e   : > { %1769 = vst [vmem:[%s2766_s17] sm:$0xff] %v1767_v22 }
 0x147   : > { %v1056_v27 = vpop.f32.mrf.mxu0 }
 0x148   : > { %v1057_v47 = vadd.f32 %v1056_v27, %v3768_v9 }
 0x14a   : > { %v1747_v51 = vpop.permute.xlu2 %1746 }
 0x14b   : > { %1750 = vst.msk [vmem:[#allocation2] sm:$0xff] %vm1749_vm3, %v1747_v51 }
 0x151   : > { %v1157_v12 = vpop.f32.mrf.mxu1  ;;  %v1211_v37 = vpop.f32.mrf.mxu2 }
 0x152   : > { %v1158_v18 = vadd.f32 %v1157_v12, %v1057_v47  ;;  %v1752_v56 = vpop.permute.xlu2 %1751 }
 0x153   : > { %1755 = vst.msk [vmem:[#allocation2] sm:$0xff] %vm1754_vm4, %v1752_v56 }
 0x154   : > { %v1212_v7 = vadd.f32 %v1211_v37, %v1158_v18  ;;  %v1250_v13 = vpop.f32.mrf.mxu3 }
 0x156   : > { %v1251_v55 = vadd.f32 %v1250_v13, %v1212_v7 }
 0x157   : > { %v1319_v0 = vpop.f32.mrf.mxu0 }
 0x158   : > { %v1320_v63 = vadd.f32 %v1319_v0, %v1251_v55 }
 0x15a   : > { %v1356_v59 = vpop.f32.mrf.mxu1 }
 0x15b   : > { %v1357_v39 = vadd.f32 %v1356_v59, %v1320_v63  ;;  %v1397_v46 = vpop.f32.mrf.mxu2 }
 0x15d   : > { %v1398_v52 = vadd.f32 %v1397_v46, %v1357_v39 }
 0x15e   : > { %v1498_v44 = vpop.f32.mrf.mxu3 }
 0x15f   : > { %v1499_v11 = vadd.f32 %v1498_v44, %v1398_v52 }
 0x16b   : > { %v1552_v9 = vpop.f32.mrf.mxu0 }
 0x16c   : > { %v1553_v3 = vadd.f32 %v1552_v9, %v1499_v11 }
 0x172   : > { %v1591_v34 = vpop.f32.mrf.mxu1 }
 0x173   : > { %v1592_v19 = vadd.f32 %v1591_v34, %v1553_v3 }
 0x175   : > { %v1660_v53 = vpop.f32.mrf.mxu2 }
 0x176   : > { %v1661_v21 = vadd.f32 %v1660_v53, %v1592_v19 }
 0x177   : > { %v1697_v28 = vpop.f32.mrf.mxu3 }
 0x178   : > { %v1698_v25 = vadd.f32 %v1697_v28, %v1661_v21 }
 0x17a   : > { %v1714_v24 = vadd.f32 %v1712_v6, %v1698_v25 }
 0x17c   : > { %v1729_v17 = vadd.f32 %v1727_v54, %v1714_v24 }
 0x17e   : > { %v1744_v48 = vadd.f32 %v1742_v40, %v1729_v17 }
 0x180   : > { %1762 = vrot.lane.b32.xlu2 %v1744_v48, %s2676_s4  ;;  %v1768_v15 = vmax.f32 %v1744_v48, 0.0  ;;  %1757 = vrot.lane.b32.xlu1 %v1744_v48, %s2675_s24 }
 0x182   : > { %1770 = vst [vmem:[%s2766_s17 + $0x8] sm:$0xff] %v1768_v15 }
 0x1da   : > { %v1763_v5 = vpop.permute.xlu2 %1762 }
 0x1f0   : > { %1777 = sbr.rel (!%p2731_p3) target bundleno = 649 (0x289), region = 44 }
 0x1f2   : > { %v1758_v32 = vpop.permute.xlu1 %1757 }
 0x1f3   : > { %1761 = vst.msk [vmem:[#allocation2] sm:$0xff] %vm1760_vm5, %v1758_v32 }
 0x1f4   : > { %1766 = vst.msk [vmem:[#allocation2] sm:$0xff] %vm1765_vm6, %v1763_v5 }
 0x1f5   : > { %s4285_s6 = smov (!%p1780_p13, %s1779_s6), 2 }
 0x1f6   : > { %s3826_s11 = sshll.u32 %s4285_s6, 3 }
 0x1f7   : > { %p2238_p0 = scmp.eq.s32.totalorder %s3826_s11, 0 }
 0x1f8   : > { %p1792_p1 = scmp.lt.u32.totalorder (!%p2238_p0), %s3826_s11, 8 }
 0x1f9   : > { %1791 = sbr.rel (%p2238_p0) target bundleno = 649 (0x289), region = 48 }
 0x1fe   : > { %1795 = sbr.rel (%p1792_p1) target bundleno = 640 (0x280), region = 52  ;;  %s3831_s20 = sand.u32 (!%p1792_p1), 7, %s3826_s11  }
 0x1ff   : > { %p1812_p2 = scmp.eq.s32.totalorder (!%p1792_p1), %s3831_s20, 0  ;;  %p2239_p3 = scmp.ne.s32.totalorder (!%p1792_p1), %s3831_s20, 0 }
 0x203   : > { %1815 = sbr.rel (%p2239_p3) target bundleno = 575 (0x23f), region = 67  ;;  %s1816_s14 = sshrl.u32 (!%p2239_p3), %s3826_s11, 3 }
 0x204   : > { %s3838_s5 = sshrl.u32 (!%p2239_p3), %s1816_s14, 5 }
 0x205   : > { %p2240_p4 = scmp.le.s32.totalorder (!%p2239_p3), %s3838_s5, 0 }
 0x208   : > { %2128 = sbr.rel (%p2240_p4) target bundleno = 558 (0x22e), region = 152  ;;  %s4268_s12 = smov (!%p2240_p4), %s3824_s10 }
 0x209   : > { %s4269_s19 = smov (!%p2240_p4), %s2766_s17  ;;  %s3847_s21 = smov (!%p2240_p4), 0  }
 0x20a   : > { %s3849_s22 = smov (!%p2240_p4), 0  }
 0x20d LB: >> { %v1827_v62 = vld [vmem:[%s2608_s19] sm:$0xff]  ;;  %v1829_v26 = vld [vmem:[%s2608_s19 + $0x8] sm:$0xff]  ;;  %v1831_v20 = vld [vmem:[%s2608_s19 + $0x10] sm:$0xff]  ;;  %s1891_s24 = sadd.s32 1, %s2612_s21  ;;  %s1821_s22 = sadd.s32 1, %s2616_s22   ;;  %s2616_s22 = sphi %s3849_s22, %s1821_s22   ;;  %s2612_s21 = sphi %s3847_s21, %s4272_s21   ;;  %s2608_s19 = sphi %s4269_s19, %s4271_s19   ;;  %s2604_s12 = sphi %s4268_s12, %s4270_s12  }
 0x20e   : >> { %1828 = vst [vmem:[%s2604_s12] sm:$0xff] %v1827_v62  ;;  %v1833_v33 = vld [vmem:[%s2608_s19 + $0x18] sm:$0xff]  ;;  %p1892_p5 = scmp.ge.s32.totalorder %s1891_s24, %s3838_s5  ;;  %v1835_v57 = vld [vmem:[%s2608_s19 + $0x20] sm:$0xff]  ;;  %v1837_v23 = vld [vmem:[%s2608_s19 + $0x28] sm:$0xff]  ;;  %p1820_p6 = scmp.ge.s32.totalorder %s1821_s22, %s3838_s5 }
 0x20f   : >> { %1830 = vst [vmem:[%s2604_s12 + $0x8] sm:$0xff] %v1829_v26  ;;  %v1839_v50 = vld [vmem:[%s2608_s19 + $0x30] sm:$0xff]  ;;  %v1841_v35 = vld [vmem:[%s2608_s19 + $0x38] sm:$0xff]  ;;  %v1843_v1 = vld [vmem:[%s2608_s19 + $0x40] sm:$0xff] }
 0x210   : >> { %1832 = vst [vmem:[%s2604_s12 + $0x10] sm:$0xff] %v1831_v20  ;;  %s4287_s24 = smov (%p1892_p5, %s1891_s24), 0  ;;  %v1845_v54 = vld [vmem:[%s2608_s19 + $0x48] sm:$0xff]  ;;  %v1847_v14 = vld [vmem:[%s2608_s19 + $0x50] sm:$0xff]  ;;  %v1849_v30 = vld [vmem:[%s2608_s19 + $0x58] sm:$0xff] }
 0x211   : >> { %1834 = vst [vmem:[%s2604_s12 + $0x18] sm:$0xff] %v1833_v33  ;;  %s2241_s25 = sshll.u32 %s4287_s24, 8  ;;  %v1851_v2 = vld [vmem:[%s2608_s19 + $0x60] sm:$0xff]  ;;  %v1853_v61 = vld [vmem:[%s2608_s19 + $0x68] sm:$0xff]  ;;  %v1855_v42 = vld [vmem:[%s2608_s19 + $0x70] sm:$0xff]  ;;  %s4272_s21 = smov %s4287_s24 }
 0x212   : >> { %1836 = vst [vmem:[%s2604_s12 + $0x20] sm:$0xff] %v1835_v57  ;;  %s3881_s26 = scalar_lea.vmem %s2766_s17, %s2241_s25 [#allocation5]   ;;  %s3884_s27 = scalar_lea.vmem %s3824_s10, %s2241_s25   ;;  %v1857_v45 = vld [vmem:[%s2608_s19 + $0x78] sm:$0xff]  ;;  %v1859_v10 = vld [vmem:[%s2608_s19 + $0x80] sm:$0xff]  ;;  %v1861_v31 = vld [vmem:[%s2608_s19 + $0x88] sm:$0xff] }
 0x213   : >> { %1838 = vst [vmem:[%s2604_s12 + $0x28] sm:$0xff] %v1837_v23  ;;  %v1863_v58 = vld [vmem:[%s2608_s19 + $0x90] sm:$0xff]  ;;  %v1865_v41 = vld [vmem:[%s2608_s19 + $0x98] sm:$0xff]  ;;  %v1867_v43 = vld [vmem:[%s2608_s19 + $0xa0] sm:$0xff] }
 0x214   : >> { %1840 = vst [vmem:[%s2604_s12 + $0x30] sm:$0xff] %v1839_v50  ;;  %v1869_v36 = vld [vmem:[%s2608_s19 + $0xa8] sm:$0xff]  ;;  %v1871_v6 = vld [vmem:[%s2608_s19 + $0xb0] sm:$0xff]  ;;  %v1873_v60 = vld [vmem:[%s2608_s19 + $0xb8] sm:$0xff] }
 0x215   : >> { %1842 = vst [vmem:[%s2604_s12 + $0x38] sm:$0xff] %v1841_v35  ;;  %v1875_v49 = vld [vmem:[%s2608_s19 + $0xc0] sm:$0xff]  ;;  %v1877_v4 = vld [vmem:[%s2608_s19 + $0xc8] sm:$0xff]  ;;  %v1879_v8 = vld [vmem:[%s2608_s19 + $0xd0] sm:$0xff] }
 0x216   : >> { %1844 = vst [vmem:[%s2604_s12 + $0x40] sm:$0xff] %v1843_v1  ;;  %v1881_v29 = vld [vmem:[%s2608_s19 + $0xd8] sm:$0xff]  ;;  %v1883_v38 = vld [vmem:[%s2608_s19 + $0xe0] sm:$0xff]  ;;  %v1885_v22 = vld [vmem:[%s2608_s19 + $0xe8] sm:$0xff] }
 0x217   : >> { %1846 = vst [vmem:[%s2604_s12 + $0x48] sm:$0xff] %v1845_v54  ;;  %v1887_v27 = vld [vmem:[%s2608_s19 + $0xf0] sm:$0xff]  ;;  %v1889_v47 = vld [vmem:[%s2608_s19 + $0xf8] sm:$0xff]  ;;  %s4271_s19 = smov %s3881_s26 }
 0x218   : >> { %1848 = vst [vmem:[%s2604_s12 + $0x50] sm:$0xff] %v1847_v14 }
 0x219   : >> { %1850 = vst [vmem:[%s2604_s12 + $0x58] sm:$0xff] %v1849_v30 }
 0x21a   : >> { %1852 = vst [vmem:[%s2604_s12 + $0x60] sm:$0xff] %v1851_v2 }
 0x21b   : >> { %1854 = vst [vmem:[%s2604_s12 + $0x68] sm:$0xff] %v1853_v61 }
 0x21c   : >> { %1856 = vst [vmem:[%s2604_s12 + $0x70] sm:$0xff] %v1855_v42 }
 0x21d   : >> { %1858 = vst [vmem:[%s2604_s12 + $0x78] sm:$0xff] %v1857_v45 }
 0x21e   : >> { %1860 = vst [vmem:[%s2604_s12 + $0x80] sm:$0xff] %v1859_v10 }
 0x21f   : >> { %1862 = vst [vmem:[%s2604_s12 + $0x88] sm:$0xff] %v1861_v31 }
 0x220   : >> { %1864 = vst [vmem:[%s2604_s12 + $0x90] sm:$0xff] %v1863_v58 }
 0x221   : >> { %1866 = vst [vmem:[%s2604_s12 + $0x98] sm:$0xff] %v1865_v41 }
 0x222   : >> { %1868 = vst [vmem:[%s2604_s12 + $0xa0] sm:$0xff] %v1867_v43 }
 0x223   : >> { %1870 = vst [vmem:[%s2604_s12 + $0xa8] sm:$0xff] %v1869_v36 }
 0x224   : >> { %1872 = vst [vmem:[%s2604_s12 + $0xb0] sm:$0xff] %v1871_v6 }
 0x225   : >> { %1874 = vst [vmem:[%s2604_s12 + $0xb8] sm:$0xff] %v1873_v60 }
 0x226   : >> { %1876 = vst [vmem:[%s2604_s12 + $0xc0] sm:$0xff] %v1875_v49 }
 0x227   : >> { %1878 = vst [vmem:[%s2604_s12 + $0xc8] sm:$0xff] %v1877_v4 }
 0x228   : >> { %1880 = vst [vmem:[%s2604_s12 + $0xd0] sm:$0xff] %v1879_v8 }
 0x229   : >> { %1882 = vst [vmem:[%s2604_s12 + $0xd8] sm:$0xff] %v1881_v29  ;;  %1823 = sbr.rel (!%p1820_p6) target bundleno = 525 (0x20d), region = 158 }
 0x22a   : >> { %1884 = vst [vmem:[%s2604_s12 + $0xe0] sm:$0xff] %v1883_v38 }
 0x22b   : >> { %1886 = vst [vmem:[%s2604_s12 + $0xe8] sm:$0xff] %v1885_v22 }
 0x22c   : >> { %1888 = vst [vmem:[%s2604_s12 + $0xf0] sm:$0xff] %v1887_v27 }
 0x22d   : >> { %1890 = vst [vmem:[%s2604_s12 + $0xf8] sm:$0xff] %v1889_v47  ;;  %s4270_s12 = smov %s3884_s27 }
 0x22e PF: > { %s3950_s28 = sand.u32 31, %s1816_s14   ;;  %s2264_s29 = sshll.u32 %s3838_s5, 8 }
 0x22f   : > { %s1902_s30 = scalar_lea.vmem %s2766_s17, %s2264_s29 [#allocation5]   ;;  %s1904_s4 = scalar_lea.vmem %s3824_s10, %s2264_s29  }
 0x230   : > { %p2246_p7 = scmp.le.s32.totalorder %s3950_s28, 0 }
 0x231   : > { %s2618_s6 = smov (!%p2246_p7), %s1904_s4   ;;  %s2622_s7 = smov (!%p2246_p7), %s1902_s30  }
 0x232   : > { %2142 = sbr.rel (%p2246_p7) target bundleno = 575 (0x23f), region = 163  ;;  %s2626_s8 = smov (!%p2246_p7), 0  }
 0x233   : > { %s2630_s9 = smov (!%p2246_p7), 0  }
 0x237 LB: >> { %v1914_v12 = vld [vmem:[%s2624_s7] sm:$0xff]  ;;  %s1916_s14 = sadd.s32 1, %s2628_s8  ;;  %s1908_s9 = sadd.s32 1, %s2632_s9   ;;  %s2632_s9 = sphi %s2630_s9, %s1908_s9   ;;  %s2628_s8 = sphi %s2626_s8, %s2627_s8   ;;  %s2624_s7 = sphi %s2622_s7, %s1921_s7   ;;  %s2620_s6 = sphi %s2618_s6, %s1922_s6  }
 0x238   : >> { %1915 = vst [vmem:[%s2620_s6] sm:$0xff] %v1914_v12  ;;  %p1917_p8 = scmp.ge.s32.totalorder %s1916_s14, %s3950_s28  ;;  %p1907_p9 = scmp.ge.s32.totalorder %s1908_s9, %s3950_s28 }
 0x23a   : >> { %s4289_s14 = smov (%p1917_p8, %s1916_s14), 0  ;;  %1910 = sbr.rel (!%p1907_p9) target bundleno = 567 (0x237), region = 169 }
 0x23b   : >> { %s2247_s5 = sshll.u32 %s4289_s14, 3  ;;  %s2627_s8 = smov %s4289_s14  }
 0x23c   : >> { %s1921_s7 = scalar_lea.vmem %s1902_s30, %s2247_s5 [#allocation5]   ;;  %s1922_s6 = scalar_lea.vmem %s1904_s4, %s2247_s5  }
 0x23f PF: > { %1925 = sbr.rel (%p1812_p2) target bundleno = 640 (0x280), region = 85  ;;  %s3962_s12 = ssub.s32 (!%p1812_p2), %s3826_s11, %s3831_s20 }
 0x240   : > { %s1931_s19 = sshrl.u32 (!%p1812_p2), %s3826_s11, 3  ;;  %s1928_s21 = scalar_lea.vmem (!%p1812_p2), %s2766_s17, %s3962_s12 [#allocation5] }
 0x241   : > { %s1930_s22 = scalar_lea.vmem (!%p1812_p2), %s3824_s10, %s3962_s12  ;;  %s3971_s24 = sshrl.u32 (!%p1812_p2), %s1931_s19, 5 }
 0x242   : > { %p2249_p10 = scmp.le.s32.totalorder (!%p1812_p2), %s3971_s24, 0 }
 0x244   : > { %2156 = sbr.rel (%p2249_p10) target bundleno = 618 (0x26a), region = 174  ;;  %s4273_s25 = smov (!%p2249_p10), %s3824_s10 }
 0x245   : > { %s4274_s26 = smov (!%p2249_p10), %s2766_s17  ;;  %s3980_s27 = smov (!%p2249_p10), 0  }
 0x246   : > { %s3982_s28 = smov (!%p2249_p10), 0  }
 0x249 LB: >> { %v1942_v18 = vld [vmem:[%s2640_s26] sm:$0xff]  ;;  %v1944_v37 = vld [vmem:[%s2640_s26 + $0x8] sm:$0xff]  ;;  %v1946_v7 = vld [vmem:[%s2640_s26 + $0x10] sm:$0xff]  ;;  %s2006_s29 = sadd.s32 1, %s2644_s27  ;;  %s1936_s28 = sadd.s32 1, %s2648_s28   ;;  %s2648_s28 = sphi %s3982_s28, %s1936_s28   ;;  %s2644_s27 = sphi %s3980_s27, %s4277_s27   ;;  %s2640_s26 = sphi %s4274_s26, %s4276_s26   ;;  %s2636_s25 = sphi %s4273_s25, %s4275_s25  }
 0x24a   : >> { %1943 = vst [vmem:[%s2636_s25] sm:$0xff] %v1942_v18  ;;  %v1948_v13 = vld [vmem:[%s2640_s26 + $0x18] sm:$0xff]  ;;  %p2007_p11 = scmp.ge.s32.totalorder %s2006_s29, %s3971_s24  ;;  %v1950_v55 = vld [vmem:[%s2640_s26 + $0x20] sm:$0xff]  ;;  %v1952_v0 = vld [vmem:[%s2640_s26 + $0x28] sm:$0xff]  ;;  %p1935_p12 = scmp.ge.s32.totalorder %s1936_s28, %s3971_s24 }
 0x24b   : >> { %1945 = vst [vmem:[%s2636_s25 + $0x8] sm:$0xff] %v1944_v37  ;;  %v1954_v51 = vld [vmem:[%s2640_s26 + $0x30] sm:$0xff]  ;;  %v1956_v63 = vld [vmem:[%s2640_s26 + $0x38] sm:$0xff]  ;;  %v1958_v59 = vld [vmem:[%s2640_s26 + $0x40] sm:$0xff] }
 0x24c   : >> { %1947 = vst [vmem:[%s2636_s25 + $0x10] sm:$0xff] %v1946_v7  ;;  %s4291_s29 = smov (%p2007_p11, %s2006_s29), 0  ;;  %v1960_v39 = vld [vmem:[%s2640_s26 + $0x48] sm:$0xff]  ;;  %v1962_v46 = vld [vmem:[%s2640_s26 + $0x50] sm:$0xff]  ;;  %v1964_v56 = vld [vmem:[%s2640_s26 + $0x58] sm:$0xff] }
 0x24d   : >> { %1949 = vst [vmem:[%s2636_s25 + $0x18] sm:$0xff] %v1948_v13  ;;  %s2250_s30 = sshll.u32 %s4291_s29, 8  ;;  %v1966_v52 = vld [vmem:[%s2640_s26 + $0x60] sm:$0xff]  ;;  %v1968_v44 = vld [vmem:[%s2640_s26 + $0x68] sm:$0xff]  ;;  %v1970_v9 = vld [vmem:[%s2640_s26 + $0x70] sm:$0xff]  ;;  %s4277_s27 = smov %s4291_s29 }
 0x24e   : >> { %1951 = vst [vmem:[%s2636_s25 + $0x20] sm:$0xff] %v1950_v55  ;;  %s4014_s4 = scalar_lea.vmem %s2766_s17, %s2250_s30 [#allocation5]   ;;  %s4017_s6 = scalar_lea.vmem %s3824_s10, %s2250_s30   ;;  %v1972_v11 = vld [vmem:[%s2640_s26 + $0x78] sm:$0xff]  ;;  %v1974_v3 = vld [vmem:[%s2640_s26 + $0x80] sm:$0xff]  ;;  %v1976_v34 = vld [vmem:[%s2640_s26 + $0x88] sm:$0xff] }
 0x24f   : >> { %1953 = vst [vmem:[%s2636_s25 + $0x28] sm:$0xff] %v1952_v0  ;;  %v1978_v19 = vld [vmem:[%s2640_s26 + $0x90] sm:$0xff]  ;;  %v1980_v53 = vld [vmem:[%s2640_s26 + $0x98] sm:$0xff]  ;;  %v1982_v16 = vld [vmem:[%s2640_s26 + $0xa0] sm:$0xff] }
 0x250   : >> { %1955 = vst [vmem:[%s2636_s25 + $0x30] sm:$0xff] %v1954_v51  ;;  %v1984_v21 = vld [vmem:[%s2640_s26 + $0xa8] sm:$0xff]  ;;  %v1986_v28 = vld [vmem:[%s2640_s26 + $0xb0] sm:$0xff]  ;;  %v1988_v25 = vld [vmem:[%s2640_s26 + $0xb8] sm:$0xff] }
 0x251   : >> { %1957 = vst [vmem:[%s2636_s25 + $0x38] sm:$0xff] %v1956_v63  ;;  %v1990_v40 = vld [vmem:[%s2640_s26 + $0xc0] sm:$0xff]  ;;  %v1992_v24 = vld [vmem:[%s2640_s26 + $0xc8] sm:$0xff]  ;;  %v1994_v17 = vld [vmem:[%s2640_s26 + $0xd0] sm:$0xff] }
 0x252   : >> { %1959 = vst [vmem:[%s2636_s25 + $0x40] sm:$0xff] %v1958_v59  ;;  %v1996_v48 = vld [vmem:[%s2640_s26 + $0xd8] sm:$0xff]  ;;  %v1998_v15 = vld [vmem:[%s2640_s26 + $0xe0] sm:$0xff]  ;;  %v2000_v32 = vld [vmem:[%s2640_s26 + $0xe8] sm:$0xff] }
 0x253   : >> { %1961 = vst [vmem:[%s2636_s25 + $0x48] sm:$0xff] %v1960_v39  ;;  %v2002_v5 = vld [vmem:[%s2640_s26 + $0xf0] sm:$0xff]  ;;  %v2004_v62 = vld [vmem:[%s2640_s26 + $0xf8] sm:$0xff]  ;;  %s4276_s26 = smov %s4014_s4 }
 0x254   : >> { %1963 = vst [vmem:[%s2636_s25 + $0x50] sm:$0xff] %v1962_v46 }
 0x255   : >> { %1965 = vst [vmem:[%s2636_s25 + $0x58] sm:$0xff] %v1964_v56 }
 0x256   : >> { %1967 = vst [vmem:[%s2636_s25 + $0x60] sm:$0xff] %v1966_v52 }
 0x257   : >> { %1969 = vst [vmem:[%s2636_s25 + $0x68] sm:$0xff] %v1968_v44 }
 0x258   : >> { %1971 = vst [vmem:[%s2636_s25 + $0x70] sm:$0xff] %v1970_v9 }
 0x259   : >> { %1973 = vst [vmem:[%s2636_s25 + $0x78] sm:$0xff] %v1972_v11 }
 0x25a   : >> { %1975 = vst [vmem:[%s2636_s25 + $0x80] sm:$0xff] %v1974_v3 }
 0x25b   : >> { %1977 = vst [vmem:[%s2636_s25 + $0x88] sm:$0xff] %v1976_v34 }
 0x25c   : >> { %1979 = vst [vmem:[%s2636_s25 + $0x90] sm:$0xff] %v1978_v19 }
 0x25d   : >> { %1981 = vst [vmem:[%s2636_s25 + $0x98] sm:$0xff] %v1980_v53 }
 0x25e   : >> { %1983 = vst [vmem:[%s2636_s25 + $0xa0] sm:$0xff] %v1982_v16 }
 0x25f   : >> { %1985 = vst [vmem:[%s2636_s25 + $0xa8] sm:$0xff] %v1984_v21 }
 0x260   : >> { %1987 = vst [vmem:[%s2636_s25 + $0xb0] sm:$0xff] %v1986_v28 }
 0x261   : >> { %1989 = vst [vmem:[%s2636_s25 + $0xb8] sm:$0xff] %v1988_v25 }
 0x262   : >> { %1991 = vst [vmem:[%s2636_s25 + $0xc0] sm:$0xff] %v1990_v40 }
 0x263   : >> { %1993 = vst [vmem:[%s2636_s25 + $0xc8] sm:$0xff] %v1992_v24 }
 0x264   : >> { %1995 = vst [vmem:[%s2636_s25 + $0xd0] sm:$0xff] %v1994_v17 }
 0x265   : >> { %1997 = vst [vmem:[%s2636_s25 + $0xd8] sm:$0xff] %v1996_v48  ;;  %1938 = sbr.rel (!%p1935_p12) target bundleno = 585 (0x249), region = 180 }
 0x266   : >> { %1999 = vst [vmem:[%s2636_s25 + $0xe0] sm:$0xff] %v1998_v15 }
 0x267   : >> { %2001 = vst [vmem:[%s2636_s25 + $0xe8] sm:$0xff] %v2000_v32 }
 0x268   : >> { %2003 = vst [vmem:[%s2636_s25 + $0xf0] sm:$0xff] %v2002_v5 }
 0x269   : >> { %2005 = vst [vmem:[%s2636_s25 + $0xf8] sm:$0xff] %v2004_v62  ;;  %s4275_s25 = smov %s4017_s6 }
 0x26a PF: > { %s4083_s7 = sand.u32 31, %s1931_s19   ;;  %s2266_s8 = sshll.u32 %s3971_s24, 8 }
 0x26b   : > { %s2017_s9 = scalar_lea.vmem %s2766_s17, %s2266_s8 [#allocation5]   ;;  %s2019_s14 = scalar_lea.vmem %s3824_s10, %s2266_s8  }
 0x26c   : > { %p2255_p13 = scmp.le.s32.totalorder %s4083_s7, 0 }
 0x26d   : > { %s2650_s5 = smov (!%p2255_p13), %s2019_s14   ;;  %s2654_s30 = smov (!%p2255_p13), %s2017_s9  }
 0x26e   : > { %2170 = sbr.rel (%p2255_p13) target bundleno = 635 (0x27b), region = 185  ;;  %s2658_s29 = smov (!%p2255_p13), 0  }
 0x26f   : > { %s2662_s4 = smov (!%p2255_p13), 0  }
 0x273 LB: >> { %v2029_v26 = vld [vmem:[%s2656_s30] sm:$0xff]  ;;  %s2031_s19 = sadd.s32 1, %s2660_s29  ;;  %s2023_s4 = sadd.s32 1, %s2664_s4   ;;  %s2664_s4 = sphi %s2662_s4, %s2023_s4   ;;  %s2660_s29 = sphi %s2658_s29, %s2659_s29   ;;  %s2656_s30 = sphi %s2654_s30, %s2036_s30   ;;  %s2652_s5 = sphi %s2650_s5, %s2037_s5  }
 0x274   : >> { %2030 = vst [vmem:[%s2652_s5] sm:$0xff] %v2029_v26  ;;  %p2032_p0 = scmp.ge.s32.totalorder %s2031_s19, %s4083_s7  ;;  %p2022_p1 = scmp.ge.s32.totalorder %s2023_s4, %s4083_s7 }
 0x276   : >> { %s4293_s19 = smov (%p2032_p0, %s2031_s19), 0  ;;  %2025 = sbr.rel (!%p2022_p1) target bundleno = 627 (0x273), region = 191 }
 0x277   : >> { %s2256_s24 = sshll.u32 %s4293_s19, 3  ;;  %s2659_s29 = smov %s4293_s19  }
 0x278   : >> { %s2036_s30 = scalar_lea.vmem %s2017_s9, %s2256_s24 [#allocation5]   ;;  %s2037_s5 = scalar_lea.vmem %s2019_s14, %s2256_s24  }
 0x27b PF: > { %s2677_s25 = smov 1  }
 0x27c   : > { %s2038_s26 = sshll.u32 %s2677_s25, %s3831_s20 }
 0x27d   : > { %s2258_s27 = sadd.s32 4294967295, %s2038_s26 }
 0x27e   : > { %v2048_v20 = vld [vmem:[%s1928_s21] sm:%s2258_s27] }
 0x27f   : > { %2049 = vst [vmem:[%s1930_s22] sm:%s2258_s27] %v2048_v20 }
 0x280 PF: > { %p2259_p2 = scmp.ge.u32.totalorder %s3826_s11, 8 }
 0x281   : > { %s2678_s28 = smov (!%p2259_p2), 1  }
 0x282   : > { %1798 = sbr.rel (%p2259_p2) target bundleno = 649 (0x289), region = 56  ;;  %s1799_s6 = sshll.u32 (!%p2259_p2), %s2678_s28, %s3826_s11 }
 0x283   : > { %s2260_s7 = sadd.s32 (!%p2259_p2), 4294967295, %s1799_s6 }
 0x287   : > { %v1809_v33 = vld [vmem:[%s2766_s17] sm:%s2260_s7] }
 0x288   : > { %1810 = vst [vmem:[%s3824_s10] sm:%s2260_s7] %v1809_v33 }
 0x289 PF: > { %s14_s16 = sadd.s32 1, %s2600_s16   ;;  %s4278_s12 = smov %s2588_s13 }
 0x28a   : > { %p11_p3 = scmp.ge.s32.totalorder %s14_s16, 5   ;;  %s4279_s13 = smov %s2744_s23 }
 0x28b   : > { %s4280_s14 = smov %s2596_s15  ;;  %s4281_s15 = smov %s4283_s18 }
 0x28c   :  { %13 = sbr.rel (!%p11_p3) target bundleno = 3 (0x3), region = 202 }
 0x291   :  { %2063 = vsyncpa [#allocation4], 1 }
 0x292   :  { %2065 = vsyncpa [#allocation4 + $0x1], 1 }

</bundles_post_ra>
